<compile_context>
chip_gen: v7x
topology: tpu7x:2x2x1
jax: 0.10.0
libtpu: 0.0.40
codegen_flags: <defaults>
</compile_context>

<pallas_src>
import functools

import jax
import jax.numpy as jnp
from jax.experimental import pallas as pl
from jax.experimental.pallas import tpu as pltpu

HIDDEN = 512


def _mlp_kernel(x_ref, w1_ref, b1_ref, w2_ref, b2_ref, w3_ref, b3_ref, o_ref):
    """3-layer MLP fused in one kernel body (all operands resident in VMEM).

    Matmul inputs use the weights' dtype (bf16 by default, f32 otherwise);
    bias add, accumulation, ReLU and tanh are always f32 (biases stay f32).
    """
    cdt = w1_ref.dtype  # matmul input dtype

    x = x_ref[...].astype(cdt)
    h1 = jnp.dot(x, w1_ref[...], preferred_element_type=jnp.float32) + b1_ref[...]
    h1 = jnp.maximum(h1, 0.0)                                    # ReLU (f32)

    h2 = jnp.dot(h1.astype(cdt), w2_ref[...],
                 preferred_element_type=jnp.float32) + b2_ref[...]
    h2 = jnp.maximum(h2, 0.0)                                    # ReLU (f32)

    h3 = jnp.dot(h2.astype(cdt), w3_ref[...],
                 preferred_element_type=jnp.float32) + b3_ref[...]
    o_ref[...] = jnp.tanh(h3).astype(o_ref.dtype)                # Tanh (f32 math)


def _pick_batch_tile(B):
    """Static (trace-time) batch tile + padded batch size.

    * B < 256: single grid step (weight-DMA bound regime; splitting the grid
      would duplicate the weight fetch per core and add per-step overhead).
    * B >= 256: 256/512/1024-row tiles to amortize the ~0.35 us per-grid-step
      cost while keeping intermediates comfortably inside VMEM.
    """
    if B < 256:
        block_b = max(8, ((B + 7) // 8) * 8)      # sublane-aligned, single step
    elif B < 1024:
        block_b = 256
    elif B < 4096:
        block_b = 512
    else:
        block_b = 1024
    Bp = ((B + block_b - 1) // block_b) * block_b
    return block_b, Bp


def _weight_specs(obs_dims, act_p, resident):
    """Specs for the six grid-invariant weight/bias operands."""
    if resident:
        # Whole-array, VMEM-resident, not pipelined: no dead double buffer.
        return [pl.BlockSpec(memory_space=pltpu.MemorySpace.VMEM) for _ in range(6)]
    # Fallback: blocked specs with constant index maps (double-buffered).
    return [
        pl.BlockSpec((obs_dims, HIDDEN), lambda i: (0, 0)),   # W1
        pl.BlockSpec((1, HIDDEN), lambda i: (0, 0)),          # b1
        pl.BlockSpec((HIDDEN, HIDDEN), lambda i: (0, 0)),     # W2
        pl.BlockSpec((1, HIDDEN), lambda i: (0, 0)),          # b2
        pl.BlockSpec((HIDDEN, act_p), lambda i: (0, 0)),      # W3 (padded cols)
        pl.BlockSpec((1, act_p), lambda i: (0, 0)),           # b3 (padded cols)
    ]


@functools.partial(jax.jit, static_argnames=("use_bf16", "resident_weights"))
def _forward(x, params, *, use_bf16, resident_weights):
    w1, b1, w2, b2, w3, b3 = params
    B, obs_dims = x.shape
    act_dims = w3.shape[1]

    # Lane-dense output: pad last layer's columns up to a multiple of 128.
    act_p = ((act_dims + 127) // 128) * 128
    if act_p != act_dims:
        w3 = jnp.pad(w3, ((0, 0), (0, act_p - act_dims)))
        b3 = jnp.pad(b3, ((0, 0), (0, act_p - act_dims)))

    # Default: bf16 matmul inputs (weights cast here, activations in-kernel).
    if use_bf16:
        w1 = w1.astype(jnp.bfloat16)
        w2 = w2.astype(jnp.bfloat16)
        w3 = w3.astype(jnp.bfloat16)

    block_b, Bp = _pick_batch_tile(B)
    if Bp != B:                  # skip the extra HBM copy when already aligned
        x = jnp.pad(x, ((0, Bp - B), (0, 0)))
    grid = (Bp // block_b,)

    # bf16 output halves the padded-output write inflation (only act_dims of
    # the 128 padded columns are real); wrapper slices + upcasts to f32.
    out_dtype = jnp.bfloat16 if use_bf16 else jnp.float32
    out_itemsize = 2 if use_bf16 else 4

    flops = 2 * Bp * (obs_dims * HIDDEN + HIDDEN * HIDDEN + HIDDEN * act_p)
    transcendentals = Bp * act_p  # tanh
    bytes_accessed = int(
        x.size * x.dtype.itemsize
        + w1.size * w1.dtype.itemsize + b1.size * b1.dtype.itemsize
        + w2.size * w2.dtype.itemsize + b2.size * b2.dtype.itemsize
        + w3.size * w3.dtype.itemsize + b3.size * b3.dtype.itemsize
        + Bp * act_p * out_itemsize
    )

    out = pl.pallas_call(
        _mlp_kernel,
        out_shape=jax.ShapeDtypeStruct((Bp, act_p), out_dtype),
        grid_spec=pltpu.PrefetchScalarGridSpec(
            num_scalar_prefetch=0,
            grid=grid,
            in_specs=[pl.BlockSpec((block_b, obs_dims), lambda i: (i, 0))]  # x tile
                     + _weight_specs(obs_dims, act_p, resident_weights),
            out_specs=pl.BlockSpec((block_b, act_p), lambda i: (i, 0)),
        ),
        compiler_params=pltpu.CompilerParams(
            dimension_semantics=("parallel",),
            vmem_limit_bytes=48 * 1024 * 1024,
        ),
        cost_estimate=pl.CostEstimate(
            flops=flops,
            transcendentals=transcendentals,
            bytes_accessed=bytes_accessed,
        ),
    )(x, w1, b1, w2, b2, w3, b3)

    return out[:B, :act_dims].astype(jnp.float32)


_RESIDENT_WEIGHTS_OK = True


def deterministic_policy_net(x, params, *, use_bf16=True):
    """x: (B, observation_dims) float32 -> (B, action_dims) float32."""
    global _RESIDENT_WEIGHTS_OK
    if _RESIDENT_WEIGHTS_OK:
        try:
            out = _forward(x, params, use_bf16=use_bf16, resident_weights=True)
            jax.block_until_ready(out)
            return out
        except Exception:
            # Defensive: fall back to blocked (double-buffered) weight specs if
            # memory_space-only input specs are rejected by this JAX version.
            _RESIDENT_WEIGHTS_OK = False
    return _forward(x, params, use_bf16=use_bf16, resident_weights=False)


def init_params(key, observation_dims, action_dims):
    """nn.Linear-style init: U(-1/sqrt(fan_in), 1/sqrt(fan_in)). Weights (in,out)."""
    ks = jax.random.split(key, 6)

    def linear(kw, kb, fan_in, fan_out):
        bound = 1.0 / jnp.sqrt(fan_in)
        w = jax.random.uniform(kw, (fan_in, fan_out), jnp.float32, -bound, bound)
        b = jax.random.uniform(kb, (1, fan_out), jnp.float32, -bound, bound)
        return w, b

    w1, b1 = linear(ks[0], ks[1], observation_dims, HIDDEN)
    w2, b2 = linear(ks[2], ks[3], HIDDEN, HIDDEN)
    w3, b3 = linear(ks[4], ks[5], HIDDEN, action_dims)
    return (w1, b1, w2, b2, w3, b3)


def _reference(x, params):
    w1, b1, w2, b2, w3, b3 = params
    h1 = jnp.maximum(x @ w1 + b1, 0.0)
    h2 = jnp.maximum(h1 @ w2 + b2, 0.0)
    return jnp.tanh(h2 @ w3 + b3)


if __name__ == "__main__":
    observation_dims = 16
    action_dims = 8

    key = jax.random.PRNGKey(0)
    kx_small, kx_med, kp = jax.random.split(key, 3)
    params = init_params(kp, observation_dims, action_dims)

    # Tiny-batch RL-serving path: single grid step, VMEM-resident bf16 weights.
    x_small = jax.random.normal(kx_small, (2, observation_dims), jnp.float32)
    ref_small = _reference(x_small, params)
    out_small = jax.block_until_ready(deterministic_policy_net(x_small, params))
    assert out_small.shape == (2, action_dims) and out_small.dtype == jnp.float32
    assert jnp.allclose(out_small, ref_small, atol=5e-2, rtol=5e-2), "bf16 small-batch mismatch"

    # Exact f32 path (tight tolerance).
    out_small_f32 = jax.block_until_ready(
        deterministic_policy_net(x_small, params, use_bf16=False))
    assert jnp.allclose(out_small_f32, ref_small, atol=1e-5, rtol=1e-5), "f32 small-batch mismatch"

    # Medium batch: 256-row tiles, row padding (300 -> 512), 2 "parallel" steps.
    x_med = jax.random.normal(kx_med, (300, observation_dims), jnp.float32)
    ref_med = _reference(x_med, params)
    out_med = jax.block_until_ready(deterministic_policy_net(x_med, params))
    assert out_med.shape == (300, action_dims)
    assert jnp.allclose(out_med, ref_med, atol=5e-2, rtol=5e-2), "bf16 medium-batch mismatch"

    out_med_f32 = jax.block_until_ready(
        deterministic_policy_net(x_med, params, use_bf16=False))
    assert jnp.allclose(out_med_f32, ref_med, atol=1e-5, rtol=1e-5), "f32 medium-batch mismatch"

    print("KERNEL_OK")
</pallas_src>

<mosaic_0001>
module attributes {stable_mosaic.version = 11 : i64} {
  func.func @_mlp_kernel(%arg0: i32, %arg1: memref<8x16xf32, #tpu.memory_space<vmem>>, %arg2: memref<16x512xbf16, #tpu.memory_space<vmem>>, %arg3: memref<1x512xf32, #tpu.memory_space<vmem>>, %arg4: memref<512x512xbf16, #tpu.memory_space<vmem>>, %arg5: memref<1x512xf32, #tpu.memory_space<vmem>>, %arg6: memref<512x128xbf16, #tpu.memory_space<vmem>>, %arg7: memref<1x128xf32, #tpu.memory_space<vmem>>, %arg8: memref<8x128xbf16, #tpu.memory_space<vmem>>) attributes {dimension_semantics = [#tpu.dimension_semantics<parallel>], iteration_bounds = array<i64: 1>, scalar_prefetch = 0 : i64, scratch_operands = 0 : i64, tpu.core_type = #tpu.core_type<tc>, window_params = [{transform_indices = @transform_0, window_bounds = array<i64: 8, 16>}, {pipeline_mode = #tpu.pipeline_mode<synchronous>, transform_indices = @transform_1, window_bounds = array<i64: 16, 512>}, {pipeline_mode = #tpu.pipeline_mode<synchronous>, transform_indices = @transform_2, window_bounds = array<i64: 1, 512>}, {pipeline_mode = #tpu.pipeline_mode<synchronous>, transform_indices = @transform_3, window_bounds = array<i64: 512, 512>}, {pipeline_mode = #tpu.pipeline_mode<synchronous>, transform_indices = @transform_4, window_bounds = array<i64: 1, 512>}, {pipeline_mode = #tpu.pipeline_mode<synchronous>, transform_indices = @transform_5, window_bounds = array<i64: 512, 128>}, {pipeline_mode = #tpu.pipeline_mode<synchronous>, transform_indices = @transform_6, window_bounds = array<i64: 1, 128>}, {transform_indices = @transform_7, window_bounds = array<i64: 8, 128>}]} {
    %c0 = arith.constant 0 : index
    %c0_0 = arith.constant 0 : index
    %0 = vector.load %arg1[%c0, %c0_0] : memref<8x16xf32, #tpu.memory_space<vmem>>, vector<8x16xf32>
    %1 = arith.truncf %0 : vector<8x16xf32> to vector<8x16xbf16>
    %c0_1 = arith.constant 0 : index
    %c0_2 = arith.constant 0 : index
    %2 = vector.load %arg2[%c0_1, %c0_2] : memref<16x512xbf16, #tpu.memory_space<vmem>>, vector<16x512xbf16>
    %cst = arith.constant dense<0.000000e+00> : vector<8x512xf32>
    %3 = tpu.matmul %1, %2, %cst {dimension_numbers = #tpu.dot_dimension_numbers<[1], [0], [0], [1], [0, 0, 1, 1], [], []>} : vector<8x16xbf16>, vector<16x512xbf16>, vector<8x512xf32> -> vector<8x512xf32>
    %c0_3 = arith.constant 0 : index
    %c0_4 = arith.constant 0 : index
    %4 = vector.load %arg3[%c0_3, %c0_4] : memref<1x512xf32, #tpu.memory_space<vmem>>, vector<1x512xf32>
    %5 = vector.broadcast %4 : vector<1x512xf32> to vector<8x512xf32>
    %6 = arith.addf %3, %5 : vector<8x512xf32>
    %cst_5 = arith.constant 0.000000e+00 : f32
    %7 = vector.broadcast %cst_5 : f32 to vector<8x512xf32>
    %8 = arith.maximumf %6, %7 : vector<8x512xf32>
    %9 = arith.truncf %8 : vector<8x512xf32> to vector<8x512xbf16>
    %c0_6 = arith.constant 0 : index
    %c0_7 = arith.constant 0 : index
    %10 = vector.load %arg4[%c0_6, %c0_7] : memref<512x512xbf16, #tpu.memory_space<vmem>>, vector<512x512xbf16>
    %cst_8 = arith.constant dense<0.000000e+00> : vector<8x512xf32>
    %11 = tpu.matmul %9, %10, %cst_8 {dimension_numbers = #tpu.dot_dimension_numbers<[1], [0], [0], [1], [0, 0, 1, 1], [], []>} : vector<8x512xbf16>, vector<512x512xbf16>, vector<8x512xf32> -> vector<8x512xf32>
    %c0_9 = arith.constant 0 : index
    %c0_10 = arith.constant 0 : index
    %12 = vector.load %arg5[%c0_9, %c0_10] : memref<1x512xf32, #tpu.memory_space<vmem>>, vector<1x512xf32>
    %13 = vector.broadcast %12 : vector<1x512xf32> to vector<8x512xf32>
    %14 = arith.addf %11, %13 : vector<8x512xf32>
    %cst_11 = arith.constant 0.000000e+00 : f32
    %15 = vector.broadcast %cst_11 : f32 to vector<8x512xf32>
    %16 = arith.maximumf %14, %15 : vector<8x512xf32>
    %17 = arith.truncf %16 : vector<8x512xf32> to vector<8x512xbf16>
    %c0_12 = arith.constant 0 : index
    %c0_13 = arith.constant 0 : index
    %18 = vector.load %arg6[%c0_12, %c0_13] : memref<512x128xbf16, #tpu.memory_space<vmem>>, vector<512x128xbf16>
    %cst_14 = arith.constant dense<0.000000e+00> : vector<8x128xf32>
    %19 = tpu.matmul %17, %18, %cst_14 {dimension_numbers = #tpu.dot_dimension_numbers<[1], [0], [0], [1], [0, 0, 1, 1], [], []>} : vector<8x512xbf16>, vector<512x128xbf16>, vector<8x128xf32> -> vector<8x128xf32>
    %c0_15 = arith.constant 0 : index
    %c0_16 = arith.constant 0 : index
    %20 = vector.load %arg7[%c0_15, %c0_16] : memref<1x128xf32, #tpu.memory_space<vmem>>, vector<1x128xf32>
    %21 = vector.broadcast %20 : vector<1x128xf32> to vector<8x128xf32>
    %22 = arith.addf %19, %21 : vector<8x128xf32>
    %23 = math.tanh %22 : vector<8x128xf32>
    %24 = arith.truncf %23 : vector<8x128xf32> to vector<8x128xbf16>
    %c0_17 = arith.constant 0 : index
    %c0_18 = arith.constant 0 : index
    %25 = vector.load %arg8[%c0_17, %c0_18] : memref<8x128xbf16, #tpu.memory_space<vmem>>, vector<8x128xbf16>
    tpu.vector_store %arg8[%c0_17, %c0_18], %24 {strides = array<i32>} : memref<8x128xbf16, #tpu.memory_space<vmem>>, vector<8x128xbf16>,
    return
  }
  func.func @transform_0(%arg0: i32) -> (i32, i32) {
    %c0_i32 = arith.constant 0 : i32
    %c0_i32_0 = arith.constant 0 : i32
    return %arg0, %c0_i32 : i32, i32
  }
  func.func @transform_1(%arg0: i32) -> (i32, i32) {
    %c0_i32 = arith.constant 0 : i32
    %c0_i32_0 = arith.constant 0 : i32
    %c0_i32_1 = arith.constant 0 : i32
    return %c0_i32, %c0_i32_0 : i32, i32
  }
  func.func @transform_2(%arg0: i32) -> (i32, i32) {
    %c0_i32 = arith.constant 0 : i32
    %c0_i32_0 = arith.constant 0 : i32
    %c0_i32_1 = arith.constant 0 : i32
    return %c0_i32, %c0_i32_0 : i32, i32
  }
  func.func @transform_3(%arg0: i32) -> (i32, i32) {
    %c0_i32 = arith.constant 0 : i32
    %c0_i32_0 = arith.constant 0 : i32
    %c0_i32_1 = arith.constant 0 : i32
    return %c0_i32, %c0_i32_0 : i32, i32
  }
  func.func @transform_4(%arg0: i32) -> (i32, i32) {
    %c0_i32 = arith.constant 0 : i32
    %c0_i32_0 = arith.constant 0 : i32
    %c0_i32_1 = arith.constant 0 : i32
    return %c0_i32, %c0_i32_0 : i32, i32
  }
  func.func @transform_5(%arg0: i32) -> (i32, i32) {
    %c0_i32 = arith.constant 0 : i32
    %c0_i32_0 = arith.constant 0 : i32
    %c0_i32_1 = arith.constant 0 : i32
    return %c0_i32, %c0_i32_0 : i32, i32
  }
  func.func @transform_6(%arg0: i32) -> (i32, i32) {
    %c0_i32 = arith.constant 0 : i32
    %c0_i32_0 = arith.constant 0 : i32
    %c0_i32_1 = arith.constant 0 : i32
    return %c0_i32, %c0_i32_0 : i32, i32
  }
  func.func @transform_7(%arg0: i32) -> (i32, i32) {
    %c0_i32 = arith.constant 0 : i32
    %c0_i32_0 = arith.constant 0 : i32
    return %arg0, %c0_i32 : i32, i32
  }
}

module attributes {stable_mosaic.version = 11 : i64} {
  func.func @_mlp_kernel(%arg0: i32, %arg1: memref<8x16xf32, #tpu.memory_space<vmem>>, %arg2: memref<16x512xbf16, #tpu.memory_space<vmem>>, %arg3: memref<1x512xf32, #tpu.memory_space<vmem>>, %arg4: memref<512x512xbf16, #tpu.memory_space<vmem>>, %arg5: memref<1x512xf32, #tpu.memory_space<vmem>>, %arg6: memref<512x128xbf16, #tpu.memory_space<vmem>>, %arg7: memref<1x128xf32, #tpu.memory_space<vmem>>, %arg8: memref<8x128xbf16, #tpu.memory_space<vmem>>) attributes {dimension_semantics = [#tpu.dimension_semantics<parallel>], iteration_bounds = array<i64: 1>, scalar_prefetch = 0 : i64, scratch_operands = 0 : i64, tpu.core_type = #tpu.core_type<tc>, window_params = [{transform_indices = @transform_0, window_bounds = array<i64: 8, 16>}, {pipeline_mode = #tpu.pipeline_mode<synchronous>, transform_indices = @transform_1, window_bounds = array<i64: 16, 512>}, {pipeline_mode = #tpu.pipeline_mode<synchronous>, transform_indices = @transform_2, window_bounds = array<i64: 1, 512>}, {pipeline_mode = #tpu.pipeline_mode<synchronous>, transform_indices = @transform_3, window_bounds = array<i64: 512, 512>}, {pipeline_mode = #tpu.pipeline_mode<synchronous>, transform_indices = @transform_4, window_bounds = array<i64: 1, 512>}, {pipeline_mode = #tpu.pipeline_mode<synchronous>, transform_indices = @transform_5, window_bounds = array<i64: 512, 128>}, {pipeline_mode = #tpu.pipeline_mode<synchronous>, transform_indices = @transform_6, window_bounds = array<i64: 1, 128>}, {transform_indices = @transform_7, window_bounds = array<i64: 8, 128>}]} {
    %c0 = arith.constant 0 : index
    %c0_0 = arith.constant 0 : index
    %0 = vector.load %arg1[%c0, %c0_0] : memref<8x16xf32, #tpu.memory_space<vmem>>, vector<8x16xf32>
    %1 = arith.truncf %0 : vector<8x16xf32> to vector<8x16xbf16>
    %c0_1 = arith.constant 0 : index
    %c0_2 = arith.constant 0 : index
    %2 = vector.load %arg2[%c0_1, %c0_2] : memref<16x512xbf16, #tpu.memory_space<vmem>>, vector<16x512xbf16>
    %cst = arith.constant dense<0.000000e+00> : vector<8x512xf32>
    %3 = tpu.matmul %1, %2, %cst {dimension_numbers = #tpu.dot_dimension_numbers<[1], [0], [0], [1], [0, 0, 1, 1], [], []>} : vector<8x16xbf16>, vector<16x512xbf16>, vector<8x512xf32> -> vector<8x512xf32>
    %c0_3 = arith.constant 0 : index
    %c0_4 = arith.constant 0 : index
    %4 = vector.load %arg3[%c0_3, %c0_4] : memref<1x512xf32, #tpu.memory_space<vmem>>, vector<1x512xf32>
    %5 = vector.broadcast %4 : vector<1x512xf32> to vector<8x512xf32>
    %6 = arith.addf %3, %5 : vector<8x512xf32>
    %cst_5 = arith.constant 0.000000e+00 : f32
    %7 = vector.broadcast %cst_5 : f32 to vector<8x512xf32>
    %8 = arith.maximumf %6, %7 : vector<8x512xf32>
    %9 = arith.truncf %8 : vector<8x512xf32> to vector<8x512xbf16>
    %c0_6 = arith.constant 0 : index
    %c0_7 = arith.constant 0 : index
    %10 = vector.load %arg4[%c0_6, %c0_7] : memref<512x512xbf16, #tpu.memory_space<vmem>>, vector<512x512xbf16>
    %cst_8 = arith.constant dense<0.000000e+00> : vector<8x512xf32>
    %11 = tpu.matmul %9, %10, %cst_8 {dimension_numbers = #tpu.dot_dimension_numbers<[1], [0], [0], [1], [0, 0, 1, 1], [], []>} : vector<8x512xbf16>, vector<512x512xbf16>, vector<8x512xf32> -> vector<8x512xf32>
    %c0_9 = arith.constant 0 : index
    %c0_10 = arith.constant 0 : index
    %12 = vector.load %arg5[%c0_9, %c0_10] : memref<1x512xf32, #tpu.memory_space<vmem>>, vector<1x512xf32>
    %13 = vector.broadcast %12 : vector<1x512xf32> to vector<8x512xf32>
    %14 = arith.addf %11, %13 : vector<8x512xf32>
    %cst_11 = arith.constant 0.000000e+00 : f32
    %15 = vector.broadcast %cst_11 : f32 to vector<8x512xf32>
    %16 = arith.maximumf %14, %15 : vector<8x512xf32>
    %17 = arith.truncf %16 : vector<8x512xf32> to vector<8x512xbf16>
    %c0_12 = arith.constant 0 : index
    %c0_13 = arith.constant 0 : index
    %18 = vector.load %arg6[%c0_12, %c0_13] : memref<512x128xbf16, #tpu.memory_space<vmem>>, vector<512x128xbf16>
    %cst_14 = arith.constant dense<0.000000e+00> : vector<8x128xf32>
    %19 = tpu.matmul %17, %18, %cst_14 {dimension_numbers = #tpu.dot_dimension_numbers<[1], [0], [0], [1], [0, 0, 1, 1], [], []>} : vector<8x512xbf16>, vector<512x128xbf16>, vector<8x128xf32> -> vector<8x128xf32>
    %c0_15 = arith.constant 0 : index
    %c0_16 = arith.constant 0 : index
    %20 = vector.load %arg7[%c0_15, %c0_16] : memref<1x128xf32, #tpu.memory_space<vmem>>, vector<1x128xf32>
    %21 = vector.broadcast %20 : vector<1x128xf32> to vector<8x128xf32>
    %22 = arith.addf %19, %21 : vector<8x128xf32>
    %23 = math.tanh %22 : vector<8x128xf32>
    %24 = arith.truncf %23 : vector<8x128xf32> to vector<8x128xbf16>
    %c0_17 = arith.constant 0 : index
    %c0_18 = arith.constant 0 : index
    %25 = vector.load %arg8[%c0_17, %c0_18] : memref<8x128xbf16, #tpu.memory_space<vmem>>, vector<8x128xbf16>
    tpu.vector_store %arg8[%c0_17, %c0_18], %24 {strides = array<i32>} : memref<8x128xbf16, #tpu.memory_space<vmem>>, vector<8x128xbf16>,
    return
  }
  func.func @transform_0(%arg0: i32) -> (i32, i32) {
    %c0_i32 = arith.constant 0 : i32
    %c0_i32_0 = arith.constant 0 : i32
    return %arg0, %c0_i32 : i32, i32
  }
  func.func @transform_1(%arg0: i32) -> (i32, i32) {
    %c0_i32 = arith.constant 0 : i32
    %c0_i32_0 = arith.constant 0 : i32
    %c0_i32_1 = arith.constant 0 : i32
    return %c0_i32, %c0_i32_0 : i32, i32
  }
  func.func @transform_2(%arg0: i32) -> (i32, i32) {
    %c0_i32 = arith.constant 0 : i32
    %c0_i32_0 = arith.constant 0 : i32
    %c0_i32_1 = arith.constant 0 : i32
    return %c0_i32, %c0_i32_0 : i32, i32
  }
  func.func @transform_3(%arg0: i32) -> (i32, i32) {
    %c0_i32 = arith.constant 0 : i32
    %c0_i32_0 = arith.constant 0 : i32
    %c0_i32_1 = arith.constant 0 : i32
    return %c0_i32, %c0_i32_0 : i32, i32
  }
  func.func @transform_4(%arg0: i32) -> (i32, i32) {
    %c0_i32 = arith.constant 0 : i32
    %c0_i32_0 = arith.constant 0 : i32
    %c0_i32_1 = arith.constant 0 : i32
    return %c0_i32, %c0_i32_0 : i32, i32
  }
  func.func @transform_5(%arg0: i32) -> (i32, i32) {
    %c0_i32 = arith.constant 0 : i32
    %c0_i32_0 = arith.constant 0 : i32
    %c0_i32_1 = arith.constant 0 : i32
    return %c0_i32, %c0_i32_0 : i32, i32
  }
  func.func @transform_6(%arg0: i32) -> (i32, i32) {
    %c0_i32 = arith.constant 0 : i32
    %c0_i32_0 = arith.constant 0 : i32
    %c0_i32_1 = arith.constant 0 : i32
    return %c0_i32, %c0_i32_0 : i32, i32
  }
  func.func @transform_7(%arg0: i32) -> (i32, i32) {
    %c0_i32 = arith.constant 0 : i32
    %c0_i32_0 = arith.constant 0 : i32
    return %arg0, %c0_i32 : i32, i32
  }
}

</mosaic_0001>

<bundles_post_ra>
// kernel: _forward.1
= control target key start
LH: loop header
LB: loop body
LE: loop exit
PB: predicated region body
PF: predicated region fallthrough
CT: control target
= control target key end

     0   :  { %v1937_v1 = vmov 0   ;;  %vm75_vm0 = vcmask 130048   ;;  %s2516_s1 = inlined_call_operand.vmem [shape: bf16[16,512], index: 1, kind: input, shape index: {}]   ;;  %s2517_s0 = inlined_call_operand.vmem [shape: f32[8,16], index: 0, kind: input, shape index: {}]   ;;  %s2518_s3 = inlined_call_operand.vmem [shape: bf16[512,512], index: 3, kind: input, shape index: {}]   ;;  %s2519_s5 = inlined_call_operand.vmem [shape: bf16[512,128], index: 5, kind: input, shape index: {}]   ;;  %s2520_s2 = inlined_call_operand.vmem [shape: f32[1,512], index: 2, kind: input, shape index: {}]   ;;  %s2521_s4 = inlined_call_operand.vmem [shape: f32[1,512], index: 4, kind: input, shape index: {}]   ;;  %s2522_s6 = inlined_call_operand.vmem [shape: f32[1,128], index: 6, kind: input, shape index: {}]   ;;  %s2523_s7 = inlined_call_operand.vmem [shape: bf16[8,128], index: 7, kind: output, shape index: {}]  }
   0x1   :  { %v1705_v0 = vld [vmem:[%s2516_s1 + $0x4] ss:$16 sps:$4 sm:$0xff]   ;;  %111 = vmatprep.mubr.bf16.mxu0 %v1937_v1  ;;  %152 = vmatprep.mubr.bf16.mxu1 %v1937_v1  ;;  %v1707_v2 = vld [vmem:[%s2516_s1] ss:$16 sps:$4 sm:$0xff]   ;;  %v1708_v5 = vld [vmem:[%s2516_s1 + $0xc] ss:$16 sps:$4 sm:$0xff]  }
   0x2   :  { %v27_v3 = vld [vmem:[%s2517_s0] sm:$0xff]  ;;  %79 = vmatprep.subr.bf16.mxu0 %v1705_v0  ;;  %v1710_v6 = vld [vmem:[%s2516_s1 + $0x8] ss:$16 sps:$4 sm:$0xff]   ;;  %120 = vmatprep.subr.bf16.mxu1 %v1708_v5  ;;  %v1716_v10 = vld [vmem:[%s2518_s3 + $0xc] ss:$16 sps:$4 sm:$0xff]  }
   0x3   :  { %v28_v4 = vpack.c.bf16 %v27_v3, %v27_v3  ;;  %80 = vmatpush1.bf16.msra.mxu0 %v1707_v2  ;;  %v1711_v7 = vld [vmem:[%s2518_s3] ss:$16 sps:$4 sm:$0xff]   ;;  %v1713_v8 = vld [vmem:[%s2518_s3 + $0x4] ss:$16 sps:$4 sm:$0xff]   ;;  %121 = vmatpush1.bf16.msra.mxu1 %v1710_v6  ;;  %v1714_v9 = vld [vmem:[%s2518_s3 + $0x8] ss:$16 sps:$4 sm:$0xff]  }
   0x4   :  { %959 = vmatprep.subr.bf16.mxu0 %v1713_v8  ;;  %v1719_v11 = vld [vmem:[%s2518_s3 + $0x24] ss:$16 sps:$4 sm:$0xff]   ;;  %1041 = vmatprep.subr.bf16.mxu1 %v1716_v10  ;;  %v1717_v12 = vld [vmem:[%s2518_s3 + $0x20] ss:$16 sps:$4 sm:$0xff]   ;;  %v1722_v13 = vld [vmem:[%s2518_s3 + $0x2c] ss:$16 sps:$4 sm:$0xff]  }
   0x5   :  { %v1720_v14 = vld [vmem:[%s2518_s3 + $0x28] ss:$16 sps:$4 sm:$0xff]   ;;  %v1725_v15 = vld [vmem:[%s2518_s3 + $0x44] ss:$16 sps:$4 sm:$0xff]   ;;  %v1728_v16 = vld [vmem:[%s2518_s3 + $0x4c] ss:$16 sps:$4 sm:$0xff]  }
   0x6   :  { %1485 = vmatmul.mubr.msk.bf16.vlgmr.msra.gmra.mrb[0].mxu0 %vm75_vm0, %v28_v4  ;;  %1486 = vmatmul.mubr.msk.bf16.vlgmr.msra.gmra.mrb[0].mxu1 %vm75_vm0, %v28_v4  ;;  %v1723_v17 = vld [vmem:[%s2518_s3 + $0x40] ss:$16 sps:$4 sm:$0xff]   ;;  %v1731_v18 = vld [vmem:[%s2518_s3 + $0x64] ss:$16 sps:$4 sm:$0xff]   ;;  %v1726_v19 = vld [vmem:[%s2518_s3 + $0x48] ss:$16 sps:$4 sm:$0xff]  }
   0x7   :  { %960 = vmatpush1.bf16.msra.mxu0 %v1711_v7  ;;  %1042 = vmatpush1.bf16.msra.mxu1 %v1714_v9  ;;  %v1734_v20 = vld [vmem:[%s2518_s3 + $0x6c] ss:$16 sps:$4 sm:$0xff]   ;;  %v1729_v21 = vld [vmem:[%s2518_s3 + $0x60] ss:$16 sps:$4 sm:$0xff]   ;;  %v1737_v22 = vld [vmem:[%s2518_s3 + $0x84] ss:$16 sps:$4 sm:$0xff]   ;;  %v35_v9 = vlaneseq }
   0x8   :  { %961 = vmatprep.subr.bf16.mxu0 %v1719_v11  ;;  %1043 = vmatprep.subr.bf16.mxu1 %v1722_v13  ;;  %v1732_v23 = vld [vmem:[%s2518_s3 + $0x68] ss:$16 sps:$4 sm:$0xff]   ;;  %v1740_v24 = vld [vmem:[%s2518_s3 + $0x8c] ss:$16 sps:$4 sm:$0xff]   ;;  %v1735_v25 = vld [vmem:[%s2518_s3 + $0x80] ss:$16 sps:$4 sm:$0xff]  }
   0x9   :  { %v1743_v26 = vld [vmem:[%s2518_s3 + $0xa4] ss:$16 sps:$4 sm:$0xff]   ;;  %v1738_v27 = vld [vmem:[%s2518_s3 + $0x88] ss:$16 sps:$4 sm:$0xff]   ;;  %v1746_v28 = vld [vmem:[%s2518_s3 + $0xac] ss:$16 sps:$4 sm:$0xff]  }
   0xa   :  { %v1741_v29 = vld [vmem:[%s2518_s3 + $0xa0] ss:$16 sps:$4 sm:$0xff]   ;;  %v1749_v30 = vld [vmem:[%s2518_s3 + $0xc4] ss:$16 sps:$4 sm:$0xff]   ;;  %v1744_v31 = vld [vmem:[%s2518_s3 + $0xa8] ss:$16 sps:$4 sm:$0xff]  }
   0xb   :  { %962 = vmatpush1.bf16.msra.mxu0 %v1717_v12  ;;  %1044 = vmatpush1.bf16.msra.mxu1 %v1720_v14  ;;  %v1752_v32 = vld [vmem:[%s2518_s3 + $0xcc] ss:$16 sps:$4 sm:$0xff]   ;;  %v1747_v33 = vld [vmem:[%s2518_s3 + $0xc0] ss:$16 sps:$4 sm:$0xff]   ;;  %v1755_v34 = vld [vmem:[%s2518_s3 + $0xe4] ss:$16 sps:$4 sm:$0xff]  }
   0xc   :  { %963 = vmatprep.subr.bf16.mxu0 %v1725_v15  ;;  %1045 = vmatprep.subr.bf16.mxu1 %v1728_v16  ;;  %v1750_v35 = vld [vmem:[%s2518_s3 + $0xc8] ss:$16 sps:$4 sm:$0xff]   ;;  %v1758_v36 = vld [vmem:[%s2518_s3 + $0xec] ss:$16 sps:$4 sm:$0xff]   ;;  %v1753_v37 = vld [vmem:[%s2518_s3 + $0xe0] ss:$16 sps:$4 sm:$0xff]  }
   0xd   :  { %v1761_v38 = vld [vmem:[%s2518_s3 + $0x104] ss:$16 sps:$4 sm:$0xff]   ;;  %v1756_v39 = vld [vmem:[%s2518_s3 + $0xe8] ss:$16 sps:$4 sm:$0xff]   ;;  %v1764_v40 = vld [vmem:[%s2518_s3 + $0x10c] ss:$16 sps:$4 sm:$0xff]  }
   0xe   :  { %v1759_v41 = vld [vmem:[%s2518_s3 + $0x100] ss:$16 sps:$4 sm:$0xff]   ;;  %v1767_v42 = vld [vmem:[%s2518_s3 + $0x124] ss:$16 sps:$4 sm:$0xff]   ;;  %v1762_v43 = vld [vmem:[%s2518_s3 + $0x108] ss:$16 sps:$4 sm:$0xff]  }
   0xf   :  { %964 = vmatpush1.bf16.msra.mxu0 %v1723_v17  ;;  %1046 = vmatpush1.bf16.msra.mxu1 %v1726_v19  ;;  %v1765_v44 = vld [vmem:[%s2518_s3 + $0x120] ss:$16 sps:$4 sm:$0xff]   ;;  %v1770_v45 = vld [vmem:[%s2518_s3 + $0x12c] ss:$16 sps:$4 sm:$0xff]   ;;  %v1768_v46 = vld [vmem:[%s2518_s3 + $0x128] ss:$16 sps:$4 sm:$0xff]  }
  0x10   :  { %965 = vmatprep.subr.bf16.mxu0 %v1731_v18  ;;  %1047 = vmatprep.subr.bf16.mxu1 %v1734_v20  ;;  %v1773_v47 = vld [vmem:[%s2518_s3 + $0x144] ss:$16 sps:$4 sm:$0xff]   ;;  %v1776_v48 = vld [vmem:[%s2518_s3 + $0x14c] ss:$16 sps:$4 sm:$0xff]   ;;  %v1771_v49 = vld [vmem:[%s2518_s3 + $0x140] ss:$16 sps:$4 sm:$0xff]  }
  0x11   :  { %v1779_v50 = vld [vmem:[%s2518_s3 + $0x164] ss:$16 sps:$4 sm:$0xff]   ;;  %v1774_v51 = vld [vmem:[%s2518_s3 + $0x148] ss:$16 sps:$4 sm:$0xff]   ;;  %v1782_v52 = vld [vmem:[%s2518_s3 + $0x16c] ss:$16 sps:$4 sm:$0xff]  }
  0x12   :  { %v1777_v53 = vld [vmem:[%s2518_s3 + $0x160] ss:$16 sps:$4 sm:$0xff]   ;;  %v1785_v54 = vld [vmem:[%s2518_s3 + $0x184] ss:$16 sps:$4 sm:$0xff]   ;;  %v1780_v55 = vld [vmem:[%s2518_s3 + $0x168] ss:$16 sps:$4 sm:$0xff]  }
  0x13   :  { %966 = vmatpush1.bf16.msra.mxu0 %v1729_v21  ;;  %1048 = vmatpush1.bf16.msra.mxu1 %v1732_v23  ;;  %v1788_v56 = vld [vmem:[%s2518_s3 + $0x18c] ss:$16 sps:$4 sm:$0xff]   ;;  %v1783_v57 = vld [vmem:[%s2518_s3 + $0x180] ss:$16 sps:$4 sm:$0xff]   ;;  %v1791_v58 = vld [vmem:[%s2518_s3 + $0x1a4] ss:$16 sps:$4 sm:$0xff]  }
  0x14   :  { %967 = vmatprep.subr.bf16.mxu0 %v1737_v22  ;;  %1049 = vmatprep.subr.bf16.mxu1 %v1740_v24  ;;  %v1786_v59 = vld [vmem:[%s2518_s3 + $0x188] ss:$16 sps:$4 sm:$0xff]   ;;  %v1794_v60 = vld [vmem:[%s2518_s3 + $0x1ac] ss:$16 sps:$4 sm:$0xff]   ;;  %v1789_v61 = vld [vmem:[%s2518_s3 + $0x1a0] ss:$16 sps:$4 sm:$0xff]  }
  0x15   :  { %v1792_v62 = vld [vmem:[%s2518_s3 + $0x1a8] ss:$16 sps:$4 sm:$0xff]   ;;  %v1797_v63 = vld [vmem:[%s2518_s3 + $0x1c4] ss:$16 sps:$4 sm:$0xff]   ;;  %v1800_v0 = vld [vmem:[%s2518_s3 + $0x1cc] ss:$16 sps:$4 sm:$0xff]  }
  0x16   :  { %v1795_v1 = vld [vmem:[%s2518_s3 + $0x1c0] ss:$16 sps:$4 sm:$0xff]   ;;  %v1798_v2 = vld [vmem:[%s2518_s3 + $0x1c8] ss:$16 sps:$4 sm:$0xff]   ;;  %v1803_v3 = vld [vmem:[%s2518_s3 + $0x1e4] ss:$16 sps:$4 sm:$0xff]  }
  0x17   :  { %968 = vmatpush1.bf16.msra.mxu0 %v1735_v25  ;;  %1050 = vmatpush1.bf16.msra.mxu1 %v1738_v27  ;;  %v1806_v4 = vld [vmem:[%s2518_s3 + $0x1ec] ss:$16 sps:$4 sm:$0xff]   ;;  %v1801_v5 = vld [vmem:[%s2518_s3 + $0x1e0] ss:$16 sps:$4 sm:$0xff]   ;;  %v1804_v6 = vld [vmem:[%s2518_s3 + $0x1e8] ss:$16 sps:$4 sm:$0xff]  }
  0x18   :  { %969 = vmatprep.subr.bf16.mxu0 %v1743_v26  ;;  %1051 = vmatprep.subr.bf16.mxu1 %v1746_v28  ;;  %v1809_v7 = vld [vmem:[%s2518_s3 + $0x204] ss:$16 sps:$4 sm:$0xff]   ;;  %v1812_v8 = vld [vmem:[%s2518_s3 + $0x20c] ss:$16 sps:$4 sm:$0xff]   ;;  %v2191_v10 = vshrl.u32 %v35_v9, 7 }
  0x19   :  { %v2197_v12 = vld [vmem:[%s2520_s2] sm:$0xf]  ;;  %v1869_v9 = vld [vmem:[%s2518_s3 + $0x344] ss:$16 sps:$4 sm:$0xff]  }
  0x1a   :  { %v37_v11 = vsub.s32 0, %v2191_v10  ;;  %v41_v13 = vsub.s32 1, %v2191_v10  ;;  %v49_v14 = vsub.s32 3, %v2191_v10 }
  0x1b   :  { %970 = vmatpush1.bf16.msra.mxu0 %v1741_v29  ;;  %1052 = vmatpush1.bf16.msra.mxu1 %v1744_v31 }
  0x1c   :  { %971 = vmatprep.subr.bf16.mxu0 %v1749_v30  ;;  %1053 = vmatprep.subr.bf16.mxu1 %v1752_v32  ;;  %v38_v15 = vrot.slane %v2197_v12, %v37_v11  ;;  %v42_v16 = vrot.slane %v2197_v12, %v41_v13  ;;  %v50_v18 = vrot.slane %v2197_v12, %v49_v14  ;;  %v1807_v32 = vld [vmem:[%s2518_s3 + $0x200] ss:$16 sps:$4 sm:$0xff]  }
  0x1f   :  { %972 = vmatpush1.bf16.msra.mxu0 %v1747_v33  ;;  %1054 = vmatpush1.bf16.msra.mxu1 %v1750_v35  ;;  %v1810_v33 = vld [vmem:[%s2518_s3 + $0x208] ss:$16 sps:$4 sm:$0xff]  }
  0x20   :  { %973 = vmatprep.subr.bf16.mxu0 %v1755_v34  ;;  %1055 = vmatprep.subr.bf16.mxu1 %v1758_v36  ;;  %v1815_v36 = vld [vmem:[%s2518_s3 + $0x224] ss:$16 sps:$4 sm:$0xff]  }
  0x23   :  { %974 = vmatpush1.bf16.msra.mxu0 %v1753_v37  ;;  %1056 = vmatpush1.bf16.msra.mxu1 %v1756_v39  ;;  %v1818_v37 = vld [vmem:[%s2518_s3 + $0x22c] ss:$16 sps:$4 sm:$0xff]   ;;  %v1813_v39 = vld [vmem:[%s2518_s3 + $0x220] ss:$16 sps:$4 sm:$0xff]  }
  0x24   :  { %975 = vmatprep.subr.bf16.mxu0 %v1761_v38  ;;  %1057 = vmatprep.subr.bf16.mxu1 %v1764_v40  ;;  %v1816_v40 = vld [vmem:[%s2518_s3 + $0x228] ss:$16 sps:$4 sm:$0xff]  }
  0x27   :  { %976 = vmatpush1.bf16.msra.mxu0 %v1759_v41  ;;  %1058 = vmatpush1.bf16.msra.mxu1 %v1762_v43  ;;  %v1821_v41 = vld [vmem:[%s2518_s3 + $0x244] ss:$16 sps:$4 sm:$0xff]   ;;  %v1819_v43 = vld [vmem:[%s2518_s3 + $0x240] ss:$16 sps:$4 sm:$0xff]  }
  0x28   :  { %977 = vmatprep.subr.bf16.mxu0 %v1767_v42  ;;  %1059 = vmatprep.subr.bf16.mxu1 %v1770_v45  ;;  %v1824_v42 = vld [vmem:[%s2518_s3 + $0x24c] ss:$16 sps:$4 sm:$0xff]   ;;  %v1827_v45 = vld [vmem:[%s2518_s3 + $0x264] ss:$16 sps:$4 sm:$0xff]  }
  0x2b   :  { %978 = vmatpush1.bf16.msra.mxu0 %v1765_v44  ;;  %1060 = vmatpush1.bf16.msra.mxu1 %v1768_v46  ;;  %v1822_v44 = vld [vmem:[%s2518_s3 + $0x248] ss:$16 sps:$4 sm:$0xff]   ;;  %v1830_v46 = vld [vmem:[%s2518_s3 + $0x26c] ss:$16 sps:$4 sm:$0xff]  }
  0x2c   :  { %979 = vmatprep.subr.bf16.mxu0 %v1773_v47  ;;  %1061 = vmatprep.subr.bf16.mxu1 %v1776_v48  ;;  %v1825_v47 = vld [vmem:[%s2518_s3 + $0x260] ss:$16 sps:$4 sm:$0xff]   ;;  %v1828_v48 = vld [vmem:[%s2518_s3 + $0x268] ss:$16 sps:$4 sm:$0xff]  }
  0x2f   :  { %980 = vmatpush1.bf16.msra.mxu0 %v1771_v49  ;;  %1062 = vmatpush1.bf16.msra.mxu1 %v1774_v51  ;;  %v1833_v49 = vld [vmem:[%s2518_s3 + $0x284] ss:$16 sps:$4 sm:$0xff]   ;;  %v1831_v51 = vld [vmem:[%s2518_s3 + $0x280] ss:$16 sps:$4 sm:$0xff]  }
  0x30   :  { %981 = vmatprep.subr.bf16.mxu0 %v1779_v50  ;;  %1063 = vmatprep.subr.bf16.mxu1 %v1782_v52  ;;  %v1836_v50 = vld [vmem:[%s2518_s3 + $0x28c] ss:$16 sps:$4 sm:$0xff]   ;;  %v1834_v52 = vld [vmem:[%s2518_s3 + $0x288] ss:$16 sps:$4 sm:$0xff]  }
  0x33   :  { %982 = vmatpush1.bf16.msra.mxu0 %v1777_v53  ;;  %1064 = vmatpush1.bf16.msra.mxu1 %v1780_v55  ;;  %v1839_v53 = vld [vmem:[%s2518_s3 + $0x2a4] ss:$16 sps:$4 sm:$0xff]   ;;  %v1837_v55 = vld [vmem:[%s2518_s3 + $0x2a0] ss:$16 sps:$4 sm:$0xff]  }
  0x34   :  { %983 = vmatprep.subr.bf16.mxu0 %v1785_v54  ;;  %1065 = vmatprep.subr.bf16.mxu1 %v1788_v56  ;;  %v1842_v54 = vld [vmem:[%s2518_s3 + $0x2ac] ss:$16 sps:$4 sm:$0xff]   ;;  %v1840_v56 = vld [vmem:[%s2518_s3 + $0x2a8] ss:$16 sps:$4 sm:$0xff]  }
  0x37   :  { %984 = vmatpush1.bf16.msra.mxu0 %v1783_v57  ;;  %1066 = vmatpush1.bf16.msra.mxu1 %v1786_v59  ;;  %v1845_v57 = vld [vmem:[%s2518_s3 + $0x2c4] ss:$16 sps:$4 sm:$0xff]   ;;  %v1843_v59 = vld [vmem:[%s2518_s3 + $0x2c0] ss:$16 sps:$4 sm:$0xff]  }
  0x38   :  { %985 = vmatprep.subr.bf16.mxu0 %v1791_v58  ;;  %1067 = vmatprep.subr.bf16.mxu1 %v1794_v60  ;;  %v1848_v58 = vld [vmem:[%s2518_s3 + $0x2cc] ss:$16 sps:$4 sm:$0xff]   ;;  %v1846_v60 = vld [vmem:[%s2518_s3 + $0x2c8] ss:$16 sps:$4 sm:$0xff]  }
  0x3b   :  { %986 = vmatpush1.bf16.msra.mxu0 %v1789_v61  ;;  %1068 = vmatpush1.bf16.msra.mxu1 %v1792_v62  ;;  %v1851_v61 = vld [vmem:[%s2518_s3 + $0x2e4] ss:$16 sps:$4 sm:$0xff]   ;;  %v1854_v62 = vld [vmem:[%s2518_s3 + $0x2ec] ss:$16 sps:$4 sm:$0xff]  }
  0x3c   :  { %987 = vmatprep.subr.bf16.mxu0 %v1797_v63  ;;  %1069 = vmatprep.subr.bf16.mxu1 %v1800_v0  ;;  %v1849_v63 = vld [vmem:[%s2518_s3 + $0x2e0] ss:$16 sps:$4 sm:$0xff]   ;;  %v1852_v0 = vld [vmem:[%s2518_s3 + $0x2e8] ss:$16 sps:$4 sm:$0xff]  }
  0x3f   :  { %988 = vmatpush1.bf16.msra.mxu0 %v1795_v1  ;;  %1070 = vmatpush1.bf16.msra.mxu1 %v1798_v2  ;;  %v1857_v1 = vld [vmem:[%s2518_s3 + $0x304] ss:$16 sps:$4 sm:$0xff]   ;;  %v1860_v2 = vld [vmem:[%s2518_s3 + $0x30c] ss:$16 sps:$4 sm:$0xff]  }
  0x40   :  { %989 = vmatprep.subr.bf16.mxu0 %v1803_v3  ;;  %1071 = vmatprep.subr.bf16.mxu1 %v1806_v4  ;;  %v1855_v3 = vld [vmem:[%s2518_s3 + $0x300] ss:$16 sps:$4 sm:$0xff]   ;;  %v1858_v4 = vld [vmem:[%s2518_s3 + $0x308] ss:$16 sps:$4 sm:$0xff]  }
  0x43   :  { %990 = vmatpush1.bf16.msra.mxu0 %v1801_v5  ;;  %1072 = vmatpush1.bf16.msra.mxu1 %v1804_v6  ;;  %v1863_v5 = vld [vmem:[%s2518_s3 + $0x324] ss:$16 sps:$4 sm:$0xff]   ;;  %v1866_v6 = vld [vmem:[%s2518_s3 + $0x32c] ss:$16 sps:$4 sm:$0xff]  }
  0x44   :  { %1000 = vmatprep.subr.bf16.mxu0 %v1809_v7  ;;  %1082 = vmatprep.subr.bf16.mxu1 %v1812_v8  ;;  %v1861_v7 = vld [vmem:[%s2518_s3 + $0x320] ss:$16 sps:$4 sm:$0xff]   ;;  %v1864_v8 = vld [vmem:[%s2518_s3 + $0x328] ss:$16 sps:$4 sm:$0xff]  }
  0xd9   :  { %v113_v17 = vpop.f32.mrb[0].mxu0  ;;  %v2210_v23 = vpop.f32.mrb[0].mxu1 }
  0xda   :  { %v114_v19 = vadd.f32 %v113_v17, %v38_v15  ;;  %v115_v20 = vpop.f32.mrb[1].mxu0  ;;  %v156_v26 = vpop.f32.mrb[1].mxu1  ;;  %v1872_v15 = vld [vmem:[%s2518_s3 + $0x34c] ss:$16 sps:$4 sm:$0xff]   ;;  %v1870_v17 = vld [vmem:[%s2518_s3 + $0x348] ss:$16 sps:$4 sm:$0xff]  }
  0xdb   :  { %v116_v21 = vadd.f32 %v115_v20, %v42_v16  ;;  %v117_v22 = vpop.f32.mrb[2].mxu0  ;;  %v157_v28 = vadd.f32 %v156_v26, %v50_v18  ;;  %v158_v29 = vpop.f32.mrb[2].mxu1  ;;  %v1867_v16 = vld [vmem:[%s2518_s3 + $0x340] ss:$16 sps:$4 sm:$0xff]   ;;  %v1875_v18 = vld [vmem:[%s2518_s3 + $0x364] ss:$16 sps:$4 sm:$0xff]  }
  0xdc   :  { %v161_v24 = vmax.f32 %v114_v19, 0.0  ;;  %v118_v25 = vpop.f32.mrb[3].mxu0  ;;  %v159_v30 = vpop.f32.mrb[3].mxu1  ;;  %v1878_v19 = vld [vmem:[%s2518_s3 + $0x36c] ss:$16 sps:$4 sm:$0xff]  }
  0xdd   :  { %v162_v27 = vmax.f32 %v116_v21, 0.0  ;;  %v164_v34 = vmax.f32 %v157_v28, 0.0  ;;  %v1873_v20 = vld [vmem:[%s2518_s3 + $0x360] ss:$16 sps:$4 sm:$0xff]   ;;  %v1876_v21 = vld [vmem:[%s2518_s3 + $0x368] ss:$16 sps:$4 sm:$0xff]  }
  0xde   :  { %v165_v35 = vpack.c.bf16 %v161_v24, %v161_v24  ;;  %v1881_v22 = vld [vmem:[%s2518_s3 + $0x384] ss:$16 sps:$4 sm:$0xff]   ;;  %v1884_v24 = vld [vmem:[%s2518_s3 + $0x38c] ss:$16 sps:$4 sm:$0xff]   ;;  %v1879_v25 = vld [vmem:[%s2518_s3 + $0x380] ss:$16 sps:$4 sm:$0xff]  }
  0xdf   :  { %v166_v31 = vpack.c.bf16 %v162_v27, %v162_v27  ;;  %v168_v38 = vpack.c.bf16 %v164_v34, %v164_v34  ;;  %v1882_v26 = vld [vmem:[%s2518_s3 + $0x388] ss:$16 sps:$4 sm:$0xff]   ;;  %v45_v27 = vsub.s32 2, %v2191_v10  ;;  %v1887_v28 = vld [vmem:[%s2518_s3 + $0x3a4] ss:$16 sps:$4 sm:$0xff]  }
  0xe0   :  { %v1890_v29 = vld [vmem:[%s2518_s3 + $0x3ac] ss:$16 sps:$4 sm:$0xff]   ;;  %v1885_v30 = vld [vmem:[%s2518_s3 + $0x3a0] ss:$16 sps:$4 sm:$0xff]  }
  0xe1   :  { %991 = vmatprep.mubr.bf16.mxu0 %v166_v31  ;;  %1073 = vmatprep.mubr.bf16.mxu1 %v166_v31  ;;  %v1888_v31 = vld [vmem:[%s2518_s3 + $0x3a8] ss:$16 sps:$4 sm:$0xff]   ;;  %v1896_v34 = vld [vmem:[%s2518_s3 + $0x3cc] ss:$16 sps:$4 sm:$0xff]  }
  0xe2   :  { %992 = vmatmul.mubr.bf16.vlgmr.msra.gmra.mrb[4].mxu0 %v165_v35  ;;  %1074 = vmatmul.mubr.bf16.vlgmr.msra.gmra.mrb[4].mxu1 %v165_v35  ;;  %v1891_v35 = vld [vmem:[%s2518_s3 + $0x3c0] ss:$16 sps:$4 sm:$0xff]  }
  0xe3   :  { %1001 = vmatpush1.bf16.msra.mxu0 %v1807_v32  ;;  %1083 = vmatpush1.bf16.msra.mxu1 %v1810_v33  ;;  %v46_v32 = vrot.slane %v2197_v12, %v45_v27  ;;  %v1893_v33 = vld [vmem:[%s2518_s3 + $0x3c4] ss:$16 sps:$4 sm:$0xff]   ;;  %v1894_v12 = vld [vmem:[%s2518_s3 + $0x3c8] ss:$16 sps:$4 sm:$0xff]  }
  0xe4   :  { %1002 = vmatprep.subr.bf16.mxu0 %v1815_v36  ;;  %1084 = vmatprep.subr.bf16.mxu1 %v1818_v37  ;;  %v1899_v37 = vld [vmem:[%s2518_s3 + $0x3e4] ss:$16 sps:$4 sm:$0xff]  }
  0xe5   :  { %1032 = vmatprep.mubr.bf16.mxu0 %v168_v38  ;;  %1114 = vmatprep.mubr.bf16.mxu1 %v168_v38  ;;  %v155_v36 = vadd.f32 %v2210_v23, %v46_v32  ;;  %v1902_v38 = vld [vmem:[%s2518_s3 + $0x3ec] ss:$16 sps:$4 sm:$0xff]   ;;  %v1900_v23 = vld [vmem:[%s2518_s3 + $0x3e8] ss:$16 sps:$4 sm:$0xff]  }
  0xe7   :  { %1003 = vmatpush1.bf16.msra.mxu0 %v1813_v39  ;;  %1085 = vmatpush1.bf16.msra.mxu1 %v1816_v40  ;;  %v1897_v39 = vld [vmem:[%s2518_s3 + $0x3e0] ss:$16 sps:$4 sm:$0xff]   ;;  %v163_v40 = vmax.f32 %v155_v36, 0.0 }
  0xe8   :  { %1004 = vmatprep.subr.bf16.mxu0 %v1821_v41  ;;  %1086 = vmatprep.subr.bf16.mxu1 %v1824_v42  ;;  %v1903_v41 = vld [vmem:[%s2519_s5 + $0x40] sm:$0xff]  }
  0xe9   :  { %v1904_v42 = vld [vmem:[%s2519_s5 + $0xc0] sm:$0xff]  }
  0xeb   :  { %1005 = vmatpush1.bf16.msra.mxu0 %v1819_v43  ;;  %1087 = vmatpush1.bf16.msra.mxu1 %v1822_v44  ;;  %v1905_v43 = vld [vmem:[%s2519_s5] sm:$0xff]  }
  0xec   :  { %1006 = vmatprep.subr.bf16.mxu0 %v1827_v45  ;;  %1088 = vmatprep.subr.bf16.mxu1 %v1830_v46  ;;  %v1906_v44 = vld [vmem:[%s2519_s5 + $0x80] sm:$0xff]   ;;  %v167_v45 = vpack.c.bf16 %v163_v40, %v163_v40  ;;  %v1907_v46 = vld [vmem:[%s2519_s5 + $0x48] sm:$0xff]  }
  0xef   :  { %1007 = vmatpush1.bf16.msra.mxu0 %v1825_v47  ;;  %1089 = vmatpush1.bf16.msra.mxu1 %v1828_v48  ;;  %v1908_v47 = vld [vmem:[%s2519_s5 + $0xc8] sm:$0xff]  }
  0xf0   :  { %1008 = vmatprep.subr.bf16.mxu0 %v1833_v49  ;;  %1090 = vmatprep.subr.bf16.mxu1 %v1836_v50  ;;  %v1909_v48 = vld [vmem:[%s2519_s5 + $0x8] sm:$0xff]   ;;  %v1911_v50 = vld [vmem:[%s2519_s5 + $0x50] sm:$0xff]  }
  0xf1   :  { %v1910_v49 = vld [vmem:[%s2519_s5 + $0x88] sm:$0xff]  }
  0xf3   :  { %1009 = vmatpush1.bf16.msra.mxu0 %v1831_v51  ;;  %1091 = vmatpush1.bf16.msra.mxu1 %v1834_v52  ;;  %v1912_v51 = vld [vmem:[%s2519_s5 + $0xd0] sm:$0xff]  }
  0xf4   :  { %1010 = vmatprep.subr.bf16.mxu0 %v1839_v53  ;;  %1092 = vmatprep.subr.bf16.mxu1 %v1842_v54  ;;  %v1913_v52 = vld [vmem:[%s2519_s5 + $0x10] sm:$0xff]   ;;  %v1915_v54 = vld [vmem:[%s2519_s5 + $0x58] sm:$0xff]  }
  0xf5   :  { %v1914_v53 = vld [vmem:[%s2519_s5 + $0x90] sm:$0xff]  }
  0xf7   :  { %1011 = vmatpush1.bf16.msra.mxu0 %v1837_v55  ;;  %1093 = vmatpush1.bf16.msra.mxu1 %v1840_v56  ;;  %v1916_v55 = vld [vmem:[%s2519_s5 + $0xd8] sm:$0xff]  }
  0xf8   :  { %1012 = vmatprep.subr.bf16.mxu0 %v1845_v57  ;;  %1094 = vmatprep.subr.bf16.mxu1 %v1848_v58  ;;  %v1917_v56 = vld [vmem:[%s2519_s5 + $0x18] sm:$0xff]   ;;  %v1919_v58 = vld [vmem:[%s2519_s5 + $0x60] sm:$0xff]  }
  0xf9   :  { %v1918_v57 = vld [vmem:[%s2519_s5 + $0x98] sm:$0xff]  }
  0xfb   :  { %1013 = vmatpush1.bf16.msra.mxu0 %v1843_v59  ;;  %1095 = vmatpush1.bf16.msra.mxu1 %v1846_v60  ;;  %v1920_v59 = vld [vmem:[%s2519_s5 + $0xe0] sm:$0xff]  }
  0xfc   :  { %1014 = vmatprep.subr.bf16.mxu0 %v1851_v61  ;;  %1096 = vmatprep.subr.bf16.mxu1 %v1854_v62  ;;  %v1921_v60 = vld [vmem:[%s2519_s5 + $0x20] sm:$0xff]   ;;  %v1923_v62 = vld [vmem:[%s2519_s5 + $0x68] sm:$0xff]  }
  0xfd   :  { %v1922_v61 = vld [vmem:[%s2519_s5 + $0xa0] sm:$0xff]  }
  0xff   :  { %1015 = vmatpush1.bf16.msra.mxu0 %v1849_v63  ;;  %1097 = vmatpush1.bf16.msra.mxu1 %v1852_v0  ;;  %v1924_v63 = vld [vmem:[%s2519_s5 + $0xe8] sm:$0xff]  }
 0x100   :  { %1016 = vmatprep.subr.bf16.mxu0 %v1857_v1  ;;  %1098 = vmatprep.subr.bf16.mxu1 %v1860_v2  ;;  %v1925_v0 = vld [vmem:[%s2519_s5 + $0x28] sm:$0xff]   ;;  %v1927_v2 = vld [vmem:[%s2519_s5 + $0x70] sm:$0xff]  }
 0x101   :  { %v1926_v1 = vld [vmem:[%s2519_s5 + $0xa8] sm:$0xff]  }
 0x103   :  { %1017 = vmatpush1.bf16.msra.mxu0 %v1855_v3  ;;  %1099 = vmatpush1.bf16.msra.mxu1 %v1858_v4  ;;  %v1928_v3 = vld [vmem:[%s2519_s5 + $0xf0] sm:$0xff]  }
 0x104   :  { %1018 = vmatprep.subr.bf16.mxu0 %v1863_v5  ;;  %1100 = vmatprep.subr.bf16.mxu1 %v1866_v6  ;;  %v1929_v4 = vld [vmem:[%s2519_s5 + $0x30] sm:$0xff]   ;;  %v1931_v6 = vld [vmem:[%s2519_s5 + $0x78] sm:$0xff]  }
 0x105   :  { %v1930_v5 = vld [vmem:[%s2519_s5 + $0xb0] sm:$0xff]  }
 0x107   :  { %1019 = vmatpush1.bf16.msra.mxu0 %v1861_v7  ;;  %1101 = vmatpush1.bf16.msra.mxu1 %v1864_v8  ;;  %v1932_v7 = vld [vmem:[%s2519_s5 + $0xf8] sm:$0xff]  }
 0x108   :  { %1020 = vmatprep.subr.bf16.mxu0 %v1869_v9  ;;  %1102 = vmatprep.subr.bf16.mxu1 %v1872_v15  ;;  %v1933_v8 = vld [vmem:[%s2519_s5 + $0x38] sm:$0xff]   ;;  %v297_v15 = vld [vmem:[%s2521_s4] sm:$0xf] }
 0x109   :  { %v1934_v9 = vld [vmem:[%s2519_s5 + $0xb8] sm:$0xff]  }
 0x10b   :  { %1021 = vmatpush1.bf16.msra.mxu0 %v1867_v16  ;;  %1103 = vmatpush1.bf16.msra.mxu1 %v1870_v17  ;;  %v302_v16 = vrot.slane %v297_v15, %v37_v11  ;;  %v310_v17 = vrot.slane %v297_v15, %v45_v27 }
 0x10c   :  { %1022 = vmatprep.subr.bf16.mxu0 %v1875_v18  ;;  %1104 = vmatprep.subr.bf16.mxu1 %v1878_v19  ;;  %v306_v18 = vrot.slane %v297_v15, %v41_v13  ;;  %v314_v19 = vrot.slane %v297_v15, %v49_v14 }
 0x10f   :  { %1023 = vmatpush1.bf16.msra.mxu0 %v1873_v20  ;;  %1105 = vmatpush1.bf16.msra.mxu1 %v1876_v21 }
 0x110   :  { %1024 = vmatprep.subr.bf16.mxu0 %v1881_v22  ;;  %1106 = vmatprep.subr.bf16.mxu1 %v1884_v24 }
 0x113   :  { %1025 = vmatpush1.bf16.msra.mxu0 %v1879_v25  ;;  %1107 = vmatpush1.bf16.msra.mxu1 %v1882_v26 }
 0x114   :  { %1026 = vmatprep.subr.bf16.mxu0 %v1887_v28  ;;  %1108 = vmatprep.subr.bf16.mxu1 %v1890_v29 }
 0x117   :  { %1027 = vmatpush1.bf16.msra.mxu0 %v1885_v30  ;;  %1109 = vmatpush1.bf16.msra.mxu1 %v1888_v31 }
 0x118   :  { %1028 = vmatprep.subr.bf16.mxu0 %v1893_v33  ;;  %1110 = vmatprep.subr.bf16.mxu1 %v1896_v34 }
 0x11b   :  { %1029 = vmatpush1.bf16.msra.mxu0 %v1891_v35  ;;  %1111 = vmatpush1.bf16.msra.mxu1 %v1894_v12 }
 0x11c   :  { %1030 = vmatprep.subr.bf16.mxu0 %v1899_v37  ;;  %1112 = vmatprep.subr.bf16.mxu1 %v1902_v38  ;;  %v1615_v38 = vld [vmem:[%s2522_s6] ss:$0 sm:$0xff] }
 0x11f   :  { %1031 = vmatpush1.bf16.msra.mxu0 %v1897_v39  ;;  %1113 = vmatpush1.bf16.msra.mxu1 %v1900_v23 }
 0x120   :  { %1648 = vmatprep.subr.bf16.mxu0 %v1903_v41  ;;  %1670 = vmatprep.subr.bf16.mxu1 %v1904_v42 }
 0x122   :  { %1033 = vmatmul.mubr.bf16.vlgmr.msra.gmra.mrb[4].mxu0 %v167_v45  ;;  %1115 = vmatmul.mubr.bf16.vlgmr.msra.gmra.mrb[4].mxu1 %v167_v45 }
 0x123   :  { %1649 = vmatpush3.bf16.msra.mxu0 %v1905_v43  ;;  %1671 = vmatpush3.bf16.msra.mxu1 %v1906_v44 }
 0x124   :  { %1650 = vmatprep.subr.bf16.mxu0 %v1907_v46  ;;  %1672 = vmatprep.subr.bf16.mxu1 %v1908_v47 }
 0x127   :  { %1651 = vmatpush3.bf16.msra.mxu0 %v1909_v48  ;;  %1673 = vmatpush3.bf16.msra.mxu1 %v1910_v49 }
 0x128   :  { %1652 = vmatprep.subr.bf16.mxu0 %v1911_v50  ;;  %1674 = vmatprep.subr.bf16.mxu1 %v1912_v51 }
 0x12b   :  { %1653 = vmatpush3.bf16.msra.mxu0 %v1913_v52  ;;  %1675 = vmatpush3.bf16.msra.mxu1 %v1914_v53 }
 0x12c   :  { %1654 = vmatprep.subr.bf16.mxu0 %v1915_v54  ;;  %1676 = vmatprep.subr.bf16.mxu1 %v1916_v55 }
 0x12f   :  { %1655 = vmatpush3.bf16.msra.mxu0 %v1917_v56  ;;  %1677 = vmatpush3.bf16.msra.mxu1 %v1918_v57 }
 0x130   :  { %1656 = vmatprep.subr.bf16.mxu0 %v1919_v58  ;;  %1678 = vmatprep.subr.bf16.mxu1 %v1920_v59 }
 0x133   :  { %1657 = vmatpush3.bf16.msra.mxu0 %v1921_v60  ;;  %1679 = vmatpush3.bf16.msra.mxu1 %v1922_v61 }
 0x134   :  { %1658 = vmatprep.subr.bf16.mxu0 %v1923_v62  ;;  %1680 = vmatprep.subr.bf16.mxu1 %v1924_v63 }
 0x137   :  { %1659 = vmatpush3.bf16.msra.mxu0 %v1925_v0  ;;  %1681 = vmatpush3.bf16.msra.mxu1 %v1926_v1 }
 0x138   :  { %1660 = vmatprep.subr.bf16.mxu0 %v1927_v2  ;;  %1682 = vmatprep.subr.bf16.mxu1 %v1928_v3 }
 0x13b   :  { %1661 = vmatpush3.bf16.msra.mxu0 %v1929_v4  ;;  %1683 = vmatpush3.bf16.msra.mxu1 %v1930_v5 }
 0x13c   :  { %1662 = vmatprep.subr.bf16.mxu0 %v1931_v6  ;;  %1684 = vmatprep.subr.bf16.mxu1 %v1932_v7 }
 0x13f   :  { %1663 = vmatpush3.bf16.msra.mxu0 %v1933_v8  ;;  %1685 = vmatpush3.bf16.msra.mxu1 %v1934_v9 }
 0x1f5   :  { %v1034_v20 = vpop.f32.mrb[4].mxu0  ;;  %v1116_v21 = vpop.f32.mrb[4].mxu1 }
 0x1f6   :  { %v1692_v22 = vadd.f32 %v1034_v20, %v302_v16  ;;  %v1694_v24 = vadd.f32 %v1116_v21, %v310_v17  ;;  %v1036_v25 = vpop.f32.mrb[5].mxu0  ;;  %v1118_v26 = vpop.f32.mrb[5].mxu1 }
 0x1f7   :  { %v1693_v28 = vadd.f32 %v1036_v25, %v306_v18  ;;  %v1695_v29 = vadd.f32 %v1118_v26, %v314_v19  ;;  %v1038_v30 = vpop.f32.mrb[6].mxu0  ;;  %v1120_v31 = vpop.f32.mrb[6].mxu1 }
 0x1f8   :  { %v1123_v11 = vmax.f32 %v1692_v22, 0.0  ;;  %v1125_v32 = vmax.f32 %v1694_v24, 0.0  ;;  %v1039_v33 = vpop.f32.mrb[7].mxu0  ;;  %v1121_v27 = vpop.f32.mrb[7].mxu1 }
 0x1f9   :  { %v1124_v34 = vmax.f32 %v1693_v28, 0.0  ;;  %v1126_v35 = vmax.f32 %v1695_v29, 0.0 }
 0x1fa   :  { %v1127_v10 = vpack.c.bf16 %v1123_v11, %v1123_v11  ;;  %v1129_v14 = vpack.c.bf16 %v1125_v32, %v1125_v32 }
 0x1fb   :  { %v1128_v13 = vpack.c.bf16 %v1124_v34, %v1124_v34  ;;  %v1130_v12 = vpack.c.bf16 %v1126_v35, %v1126_v35 }
 0x1fd   :  { %1426 = vmatprep.mubr.bf16.mxu0 %v1128_v13  ;;  %1466 = vmatprep.mubr.bf16.mxu1 %v1130_v12 }
 0x1fe   :  { %1427 = vmatmul.mubr.bf16.vlgmr.msra.gmra.mrb[8].mxu0 %v1127_v10  ;;  %1467 = vmatmul.mubr.bf16.vlgmr.msra.gmra.mrb[8].mxu1 %v1129_v14 }
 0x2d1   :  { %v1664_v36 = vpop.f32.mrb[8].mxu0  ;;  %v1686_v37 = vpop.f32.mrb[8].mxu1 }
 0x2d2   :  { %v1665_v39 = vpop.f32.mrb[9].mxu0  ;;  %v1687_v23 = vpop.f32.mrb[9].mxu1 }
 0x2d3   :  { %v1666_v40 = vadd.f32 %v1665_v39, %v1664_v36  ;;  %v1688_v41 = vadd.f32 %v1687_v23, %v1686_v37  ;;  %v1667_v42 = vpop.f32.mrb[10].mxu0  ;;  %v1689_v43 = vpop.f32.mrb[10].mxu1 }
 0x2d4   :  { %v1668_v44 = vpop.f32.mrb[11].mxu0  ;;  %v1690_v45 = vpop.f32.mrb[11].mxu1 }
 0x2d5   :  { %v1429_v46 = vadd.f32 %v1666_v40, %v1615_v38 }
 0x2d7   :  { %v1469_v47 = vadd.f32 %v1688_v41, %v1429_v46 }
 0x2d9   :  { %1935 = vtanh.f32 %v1469_v47 }
 0x2e3   :  { %v1936_v48 = vpop.eup %1935 }
 0x2e4   :  { %v1475_v49 = vpack.c.bf16 %v1936_v48, %v1936_v48 }
 0x2e6   :  { %1476 = vst [vmem:[%s2523_s7] sm:$0xf] %v1475_v49 }

// kernel: _forward.1
= control target key start
LH: loop header
LB: loop body
LE: loop exit
PB: predicated region body
PF: predicated region fallthrough
CT: control target
= control target key end

     0   :  { %v1937_v1 = vmov 0   ;;  %vm75_vm0 = vcmask 130048   ;;  %s2516_s1 = inlined_call_operand.vmem [shape: bf16[16,512], index: 1, kind: input, shape index: {}]   ;;  %s2517_s0 = inlined_call_operand.vmem [shape: f32[8,16], index: 0, kind: input, shape index: {}]   ;;  %s2518_s3 = inlined_call_operand.vmem [shape: bf16[512,512], index: 3, kind: input, shape index: {}]   ;;  %s2519_s5 = inlined_call_operand.vmem [shape: bf16[512,128], index: 5, kind: input, shape index: {}]   ;;  %s2520_s2 = inlined_call_operand.vmem [shape: f32[1,512], index: 2, kind: input, shape index: {}]   ;;  %s2521_s4 = inlined_call_operand.vmem [shape: f32[1,512], index: 4, kind: input, shape index: {}]   ;;  %s2522_s6 = inlined_call_operand.vmem [shape: f32[1,128], index: 6, kind: input, shape index: {}]   ;;  %s2523_s7 = inlined_call_operand.vmem [shape: bf16[8,128], index: 7, kind: output, shape index: {}]  }
   0x1   :  { %v1705_v0 = vld [vmem:[%s2516_s1 + $0x4] ss:$16 sps:$4 sm:$0xff]   ;;  %111 = vmatprep.mubr.bf16.mxu0 %v1937_v1  ;;  %152 = vmatprep.mubr.bf16.mxu1 %v1937_v1  ;;  %v1707_v2 = vld [vmem:[%s2516_s1] ss:$16 sps:$4 sm:$0xff]   ;;  %v1708_v5 = vld [vmem:[%s2516_s1 + $0xc] ss:$16 sps:$4 sm:$0xff]  }
   0x2   :  { %v27_v3 = vld [vmem:[%s2517_s0] sm:$0xff]  ;;  %79 = vmatprep.subr.bf16.mxu0 %v1705_v0  ;;  %v1710_v6 = vld [vmem:[%s2516_s1 + $0x8] ss:$16 sps:$4 sm:$0xff]   ;;  %120 = vmatprep.subr.bf16.mxu1 %v1708_v5  ;;  %v1716_v10 = vld [vmem:[%s2518_s3 + $0xc] ss:$16 sps:$4 sm:$0xff]  }
   0x3   :  { %v28_v4 = vpack.c.bf16 %v27_v3, %v27_v3  ;;  %80 = vmatpush1.bf16.msra.mxu0 %v1707_v2  ;;  %v1711_v7 = vld [vmem:[%s2518_s3] ss:$16 sps:$4 sm:$0xff]   ;;  %v1713_v8 = vld [vmem:[%s2518_s3 + $0x4] ss:$16 sps:$4 sm:$0xff]   ;;  %121 = vmatpush1.bf16.msra.mxu1 %v1710_v6  ;;  %v1714_v9 = vld [vmem:[%s2518_s3 + $0x8] ss:$16 sps:$4 sm:$0xff]  }
   0x4   :  { %959 = vmatprep.subr.bf16.mxu0 %v1713_v8  ;;  %v1719_v11 = vld [vmem:[%s2518_s3 + $0x24] ss:$16 sps:$4 sm:$0xff]   ;;  %1041 = vmatprep.subr.bf16.mxu1 %v1716_v10  ;;  %v1717_v12 = vld [vmem:[%s2518_s3 + $0x20] ss:$16 sps:$4 sm:$0xff]   ;;  %v1722_v13 = vld [vmem:[%s2518_s3 + $0x2c] ss:$16 sps:$4 sm:$0xff]  }
   0x5   :  { %v1720_v14 = vld [vmem:[%s2518_s3 + $0x28] ss:$16 sps:$4 sm:$0xff]   ;;  %v1725_v15 = vld [vmem:[%s2518_s3 + $0x44] ss:$16 sps:$4 sm:$0xff]   ;;  %v1728_v16 = vld [vmem:[%s2518_s3 + $0x4c] ss:$16 sps:$4 sm:$0xff]  }
   0x6   :  { %1485 = vmatmul.mubr.msk.bf16.vlgmr.msra.gmra.mrb[0].mxu0 %vm75_vm0, %v28_v4  ;;  %1486 = vmatmul.mubr.msk.bf16.vlgmr.msra.gmra.mrb[0].mxu1 %vm75_vm0, %v28_v4  ;;  %v1723_v17 = vld [vmem:[%s2518_s3 + $0x40] ss:$16 sps:$4 sm:$0xff]   ;;  %v1731_v18 = vld [vmem:[%s2518_s3 + $0x64] ss:$16 sps:$4 sm:$0xff]   ;;  %v1726_v19 = vld [vmem:[%s2518_s3 + $0x48] ss:$16 sps:$4 sm:$0xff]  }
   0x7   :  { %960 = vmatpush1.bf16.msra.mxu0 %v1711_v7  ;;  %1042 = vmatpush1.bf16.msra.mxu1 %v1714_v9  ;;  %v1734_v20 = vld [vmem:[%s2518_s3 + $0x6c] ss:$16 sps:$4 sm:$0xff]   ;;  %v1729_v21 = vld [vmem:[%s2518_s3 + $0x60] ss:$16 sps:$4 sm:$0xff]   ;;  %v1737_v22 = vld [vmem:[%s2518_s3 + $0x84] ss:$16 sps:$4 sm:$0xff]   ;;  %v35_v9 = vlaneseq }
   0x8   :  { %961 = vmatprep.subr.bf16.mxu0 %v1719_v11  ;;  %1043 = vmatprep.subr.bf16.mxu1 %v1722_v13  ;;  %v1732_v23 = vld [vmem:[%s2518_s3 + $0x68] ss:$16 sps:$4 sm:$0xff]   ;;  %v1740_v24 = vld [vmem:[%s2518_s3 + $0x8c] ss:$16 sps:$4 sm:$0xff]   ;;  %v1735_v25 = vld [vmem:[%s2518_s3 + $0x80] ss:$16 sps:$4 sm:$0xff]  }
   0x9   :  { %v1743_v26 = vld [vmem:[%s2518_s3 + $0xa4] ss:$16 sps:$4 sm:$0xff]   ;;  %v1738_v27 = vld [vmem:[%s2518_s3 + $0x88] ss:$16 sps:$4 sm:$0xff]   ;;  %v1746_v28 = vld [vmem:[%s2518_s3 + $0xac] ss:$16 sps:$4 sm:$0xff]  }
   0xa   :  { %v1741_v29 = vld [vmem:[%s2518_s3 + $0xa0] ss:$16 sps:$4 sm:$0xff]   ;;  %v1749_v30 = vld [vmem:[%s2518_s3 + $0xc4] ss:$16 sps:$4 sm:$0xff]   ;;  %v1744_v31 = vld [vmem:[%s2518_s3 + $0xa8] ss:$16 sps:$4 sm:$0xff]  }
   0xb   :  { %962 = vmatpush1.bf16.msra.mxu0 %v1717_v12  ;;  %1044 = vmatpush1.bf16.msra.mxu1 %v1720_v14  ;;  %v1752_v32 = vld [vmem:[%s2518_s3 + $0xcc] ss:$16 sps:$4 sm:$0xff]   ;;  %v1747_v33 = vld [vmem:[%s2518_s3 + $0xc0] ss:$16 sps:$4 sm:$0xff]   ;;  %v1755_v34 = vld [vmem:[%s2518_s3 + $0xe4] ss:$16 sps:$4 sm:$0xff]  }
   0xc   :  { %963 = vmatprep.subr.bf16.mxu0 %v1725_v15  ;;  %1045 = vmatprep.subr.bf16.mxu1 %v1728_v16  ;;  %v1750_v35 = vld [vmem:[%s2518_s3 + $0xc8] ss:$16 sps:$4 sm:$0xff]   ;;  %v1758_v36 = vld [vmem:[%s2518_s3 + $0xec] ss:$16 sps:$4 sm:$0xff]   ;;  %v1753_v37 = vld [vmem:[%s2518_s3 + $0xe0] ss:$16 sps:$4 sm:$0xff]  }
   0xd   :  { %v1761_v38 = vld [vmem:[%s2518_s3 + $0x104] ss:$16 sps:$4 sm:$0xff]   ;;  %v1756_v39 = vld [vmem:[%s2518_s3 + $0xe8] ss:$16 sps:$4 sm:$0xff]   ;;  %v1764_v40 = vld [vmem:[%s2518_s3 + $0x10c] ss:$16 sps:$4 sm:$0xff]  }
   0xe   :  { %v1759_v41 = vld [vmem:[%s2518_s3 + $0x100] ss:$16 sps:$4 sm:$0xff]   ;;  %v1767_v42 = vld [vmem:[%s2518_s3 + $0x124] ss:$16 sps:$4 sm:$0xff]   ;;  %v1762_v43 = vld [vmem:[%s2518_s3 + $0x108] ss:$16 sps:$4 sm:$0xff]  }
   0xf   :  { %964 = vmatpush1.bf16.msra.mxu0 %v1723_v17  ;;  %1046 = vmatpush1.bf16.msra.mxu1 %v1726_v19  ;;  %v1765_v44 = vld [vmem:[%s2518_s3 + $0x120] ss:$16 sps:$4 sm:$0xff]   ;;  %v1770_v45 = vld [vmem:[%s2518_s3 + $0x12c] ss:$16 sps:$4 sm:$0xff]   ;;  %v1768_v46 = vld [vmem:[%s2518_s3 + $0x128] ss:$16 sps:$4 sm:$0xff]  }
  0x10   :  { %965 = vmatprep.subr.bf16.mxu0 %v1731_v18  ;;  %1047 = vmatprep.subr.bf16.mxu1 %v1734_v20  ;;  %v1773_v47 = vld [vmem:[%s2518_s3 + $0x144] ss:$16 sps:$4 sm:$0xff]   ;;  %v1776_v48 = vld [vmem:[%s2518_s3 + $0x14c] ss:$16 sps:$4 sm:$0xff]   ;;  %v1771_v49 = vld [vmem:[%s2518_s3 + $0x140] ss:$16 sps:$4 sm:$0xff]  }
  0x11   :  { %v1779_v50 = vld [vmem:[%s2518_s3 + $0x164] ss:$16 sps:$4 sm:$0xff]   ;;  %v1774_v51 = vld [vmem:[%s2518_s3 + $0x148] ss:$16 sps:$4 sm:$0xff]   ;;  %v1782_v52 = vld [vmem:[%s2518_s3 + $0x16c] ss:$16 sps:$4 sm:$0xff]  }
  0x12   :  { %v1777_v53 = vld [vmem:[%s2518_s3 + $0x160] ss:$16 sps:$4 sm:$0xff]   ;;  %v1785_v54 = vld [vmem:[%s2518_s3 + $0x184] ss:$16 sps:$4 sm:$0xff]   ;;  %v1780_v55 = vld [vmem:[%s2518_s3 + $0x168] ss:$16 sps:$4 sm:$0xff]  }
  0x13   :  { %966 = vmatpush1.bf16.msra.mxu0 %v1729_v21  ;;  %1048 = vmatpush1.bf16.msra.mxu1 %v1732_v23  ;;  %v1788_v56 = vld [vmem:[%s2518_s3 + $0x18c] ss:$16 sps:$4 sm:$0xff]   ;;  %v1783_v57 = vld [vmem:[%s2518_s3 + $0x180] ss:$16 sps:$4 sm:$0xff]   ;;  %v1791_v58 = vld [vmem:[%s2518_s3 + $0x1a4] ss:$16 sps:$4 sm:$0xff]  }
  0x14   :  { %967 = vmatprep.subr.bf16.mxu0 %v1737_v22  ;;  %1049 = vmatprep.subr.bf16.mxu1 %v1740_v24  ;;  %v1786_v59 = vld [vmem:[%s2518_s3 + $0x188] ss:$16 sps:$4 sm:$0xff]   ;;  %v1794_v60 = vld [vmem:[%s2518_s3 + $0x1ac] ss:$16 sps:$4 sm:$0xff]   ;;  %v1789_v61 = vld [vmem:[%s2518_s3 + $0x1a0] ss:$16 sps:$4 sm:$0xff]  }
  0x15   :  { %v1792_v62 = vld [vmem:[%s2518_s3 + $0x1a8] ss:$16 sps:$4 sm:$0xff]   ;;  %v1797_v63 = vld [vmem:[%s2518_s3 + $0x1c4] ss:$16 sps:$4 sm:$0xff]   ;;  %v1800_v0 = vld [vmem:[%s2518_s3 + $0x1cc] ss:$16 sps:$4 sm:$0xff]  }
  0x16   :  { %v1795_v1 = vld [vmem:[%s2518_s3 + $0x1c0] ss:$16 sps:$4 sm:$0xff]   ;;  %v1798_v2 = vld [vmem:[%s2518_s3 + $0x1c8] ss:$16 sps:$4 sm:$0xff]   ;;  %v1803_v3 = vld [vmem:[%s2518_s3 + $0x1e4] ss:$16 sps:$4 sm:$0xff]  }
  0x17   :  { %968 = vmatpush1.bf16.msra.mxu0 %v1735_v25  ;;  %1050 = vmatpush1.bf16.msra.mxu1 %v1738_v27  ;;  %v1806_v4 = vld [vmem:[%s2518_s3 + $0x1ec] ss:$16 sps:$4 sm:$0xff]   ;;  %v1801_v5 = vld [vmem:[%s2518_s3 + $0x1e0] ss:$16 sps:$4 sm:$0xff]   ;;  %v1804_v6 = vld [vmem:[%s2518_s3 + $0x1e8] ss:$16 sps:$4 sm:$0xff]  }
  0x18   :  { %969 = vmatprep.subr.bf16.mxu0 %v1743_v26  ;;  %1051 = vmatprep.subr.bf16.mxu1 %v1746_v28  ;;  %v1809_v7 = vld [vmem:[%s2518_s3 + $0x204] ss:$16 sps:$4 sm:$0xff]   ;;  %v1812_v8 = vld [vmem:[%s2518_s3 + $0x20c] ss:$16 sps:$4 sm:$0xff]   ;;  %v2191_v10 = vshrl.u32 %v35_v9, 7 }
  0x19   :  { %v2197_v12 = vld [vmem:[%s2520_s2] sm:$0xf]  ;;  %v1869_v9 = vld [vmem:[%s2518_s3 + $0x344] ss:$16 sps:$4 sm:$0xff]  }
  0x1a   :  { %v37_v11 = vsub.s32 0, %v2191_v10  ;;  %v41_v13 = vsub.s32 1, %v2191_v10  ;;  %v49_v14 = vsub.s32 3, %v2191_v10 }
  0x1b   :  { %970 = vmatpush1.bf16.msra.mxu0 %v1741_v29  ;;  %1052 = vmatpush1.bf16.msra.mxu1 %v1744_v31 }
  0x1c   :  { %971 = vmatprep.subr.bf16.mxu0 %v1749_v30  ;;  %1053 = vmatprep.subr.bf16.mxu1 %v1752_v32  ;;  %v38_v15 = vrot.slane %v2197_v12, %v37_v11  ;;  %v42_v16 = vrot.slane %v2197_v12, %v41_v13  ;;  %v50_v18 = vrot.slane %v2197_v12, %v49_v14  ;;  %v1807_v32 = vld [vmem:[%s2518_s3 + $0x200] ss:$16 sps:$4 sm:$0xff]  }
  0x1f   :  { %972 = vmatpush1.bf16.msra.mxu0 %v1747_v33  ;;  %1054 = vmatpush1.bf16.msra.mxu1 %v1750_v35  ;;  %v1810_v33 = vld [vmem:[%s2518_s3 + $0x208] ss:$16 sps:$4 sm:$0xff]  }
  0x20   :  { %973 = vmatprep.subr.bf16.mxu0 %v1755_v34  ;;  %1055 = vmatprep.subr.bf16.mxu1 %v1758_v36  ;;  %v1815_v36 = vld [vmem:[%s2518_s3 + $0x224] ss:$16 sps:$4 sm:$0xff]  }
  0x23   :  { %974 = vmatpush1.bf16.msra.mxu0 %v1753_v37  ;;  %1056 = vmatpush1.bf16.msra.mxu1 %v1756_v39  ;;  %v1818_v37 = vld [vmem:[%s2518_s3 + $0x22c] ss:$16 sps:$4 sm:$0xff]   ;;  %v1813_v39 = vld [vmem:[%s2518_s3 + $0x220] ss:$16 sps:$4 sm:$0xff]  }
  0x24   :  { %975 = vmatprep.subr.bf16.mxu0 %v1761_v38  ;;  %1057 = vmatprep.subr.bf16.mxu1 %v1764_v40  ;;  %v1816_v40 = vld [vmem:[%s2518_s3 + $0x228] ss:$16 sps:$4 sm:$0xff]  }
  0x27   :  { %976 = vmatpush1.bf16.msra.mxu0 %v1759_v41  ;;  %1058 = vmatpush1.bf16.msra.mxu1 %v1762_v43  ;;  %v1821_v41 = vld [vmem:[%s2518_s3 + $0x244] ss:$16 sps:$4 sm:$0xff]   ;;  %v1819_v43 = vld [vmem:[%s2518_s3 + $0x240] ss:$16 sps:$4 sm:$0xff]  }
  0x28   :  { %977 = vmatprep.subr.bf16.mxu0 %v1767_v42  ;;  %1059 = vmatprep.subr.bf16.mxu1 %v1770_v45  ;;  %v1824_v42 = vld [vmem:[%s2518_s3 + $0x24c] ss:$16 sps:$4 sm:$0xff]   ;;  %v1827_v45 = vld [vmem:[%s2518_s3 + $0x264] ss:$16 sps:$4 sm:$0xff]  }
  0x2b   :  { %978 = vmatpush1.bf16.msra.mxu0 %v1765_v44  ;;  %1060 = vmatpush1.bf16.msra.mxu1 %v1768_v46  ;;  %v1822_v44 = vld [vmem:[%s2518_s3 + $0x248] ss:$16 sps:$4 sm:$0xff]   ;;  %v1830_v46 = vld [vmem:[%s2518_s3 + $0x26c] ss:$16 sps:$4 sm:$0xff]  }
  0x2c   :  { %979 = vmatprep.subr.bf16.mxu0 %v1773_v47  ;;  %1061 = vmatprep.subr.bf16.mxu1 %v1776_v48  ;;  %v1825_v47 = vld [vmem:[%s2518_s3 + $0x260] ss:$16 sps:$4 sm:$0xff]   ;;  %v1828_v48 = vld [vmem:[%s2518_s3 + $0x268] ss:$16 sps:$4 sm:$0xff]  }
  0x2f   :  { %980 = vmatpush1.bf16.msra.mxu0 %v1771_v49  ;;  %1062 = vmatpush1.bf16.msra.mxu1 %v1774_v51  ;;  %v1833_v49 = vld [vmem:[%s2518_s3 + $0x284] ss:$16 sps:$4 sm:$0xff]   ;;  %v1831_v51 = vld [vmem:[%s2518_s3 + $0x280] ss:$16 sps:$4 sm:$0xff]  }
  0x30   :  { %981 = vmatprep.subr.bf16.mxu0 %v1779_v50  ;;  %1063 = vmatprep.subr.bf16.mxu1 %v1782_v52  ;;  %v1836_v50 = vld [vmem:[%s2518_s3 + $0x28c] ss:$16 sps:$4 sm:$0xff]   ;;  %v1834_v52 = vld [vmem:[%s2518_s3 + $0x288] ss:$16 sps:$4 sm:$0xff]  }
  0x33   :  { %982 = vmatpush1.bf16.msra.mxu0 %v1777_v53  ;;  %1064 = vmatpush1.bf16.msra.mxu1 %v1780_v55  ;;  %v1839_v53 = vld [vmem:[%s2518_s3 + $0x2a4] ss:$16 sps:$4 sm:$0xff]   ;;  %v1837_v55 = vld [vmem:[%s2518_s3 + $0x2a0] ss:$16 sps:$4 sm:$0xff]  }
  0x34   :  { %983 = vmatprep.subr.bf16.mxu0 %v1785_v54  ;;  %1065 = vmatprep.subr.bf16.mxu1 %v1788_v56  ;;  %v1842_v54 = vld [vmem:[%s2518_s3 + $0x2ac] ss:$16 sps:$4 sm:$0xff]   ;;  %v1840_v56 = vld [vmem:[%s2518_s3 + $0x2a8] ss:$16 sps:$4 sm:$0xff]  }
  0x37   :  { %984 = vmatpush1.bf16.msra.mxu0 %v1783_v57  ;;  %1066 = vmatpush1.bf16.msra.mxu1 %v1786_v59  ;;  %v1845_v57 = vld [vmem:[%s2518_s3 + $0x2c4] ss:$16 sps:$4 sm:$0xff]   ;;  %v1843_v59 = vld [vmem:[%s2518_s3 + $0x2c0] ss:$16 sps:$4 sm:$0xff]  }
  0x38   :  { %985 = vmatprep.subr.bf16.mxu0 %v1791_v58  ;;  %1067 = vmatprep.subr.bf16.mxu1 %v1794_v60  ;;  %v1848_v58 = vld [vmem:[%s2518_s3 + $0x2cc] ss:$16 sps:$4 sm:$0xff]   ;;  %v1846_v60 = vld [vmem:[%s2518_s3 + $0x2c8] ss:$16 sps:$4 sm:$0xff]  }
  0x3b   :  { %986 = vmatpush1.bf16.msra.mxu0 %v1789_v61  ;;  %1068 = vmatpush1.bf16.msra.mxu1 %v1792_v62  ;;  %v1851_v61 = vld [vmem:[%s2518_s3 + $0x2e4] ss:$16 sps:$4 sm:$0xff]   ;;  %v1854_v62 = vld [vmem:[%s2518_s3 + $0x2ec] ss:$16 sps:$4 sm:$0xff]  }
  0x3c   :  { %987 = vmatprep.subr.bf16.mxu0 %v1797_v63  ;;  %1069 = vmatprep.subr.bf16.mxu1 %v1800_v0  ;;  %v1849_v63 = vld [vmem:[%s2518_s3 + $0x2e0] ss:$16 sps:$4 sm:$0xff]   ;;  %v1852_v0 = vld [vmem:[%s2518_s3 + $0x2e8] ss:$16 sps:$4 sm:$0xff]  }
  0x3f   :  { %988 = vmatpush1.bf16.msra.mxu0 %v1795_v1  ;;  %1070 = vmatpush1.bf16.msra.mxu1 %v1798_v2  ;;  %v1857_v1 = vld [vmem:[%s2518_s3 + $0x304] ss:$16 sps:$4 sm:$0xff]   ;;  %v1860_v2 = vld [vmem:[%s2518_s3 + $0x30c] ss:$16 sps:$4 sm:$0xff]  }
  0x40   :  { %989 = vmatprep.subr.bf16.mxu0 %v1803_v3  ;;  %1071 = vmatprep.subr.bf16.mxu1 %v1806_v4  ;;  %v1855_v3 = vld [vmem:[%s2518_s3 + $0x300] ss:$16 sps:$4 sm:$0xff]   ;;  %v1858_v4 = vld [vmem:[%s2518_s3 + $0x308] ss:$16 sps:$4 sm:$0xff]  }
  0x43   :  { %990 = vmatpush1.bf16.msra.mxu0 %v1801_v5  ;;  %1072 = vmatpush1.bf16.msra.mxu1 %v1804_v6  ;;  %v1863_v5 = vld [vmem:[%s2518_s3 + $0x324] ss:$16 sps:$4 sm:$0xff]   ;;  %v1866_v6 = vld [vmem:[%s2518_s3 + $0x32c] ss:$16 sps:$4 sm:$0xff]  }
  0x44   :  { %1000 = vmatprep.subr.bf16.mxu0 %v1809_v7  ;;  %1082 = vmatprep.subr.bf16.mxu1 %v1812_v8  ;;  %v1861_v7 = vld [vmem:[%s2518_s3 + $0x320] ss:$16 sps:$4 sm:$0xff]   ;;  %v1864_v8 = vld [vmem:[%s2518_s3 + $0x328] ss:$16 sps:$4 sm:$0xff]  }
  0xd9   :  { %v113_v17 = vpop.f32.mrb[0].mxu0  ;;  %v2210_v23 = vpop.f32.mrb[0].mxu1 }
  0xda   :  { %v114_v19 = vadd.f32 %v113_v17, %v38_v15  ;;  %v115_v20 = vpop.f32.mrb[1].mxu0  ;;  %v156_v26 = vpop.f32.mrb[1].mxu1  ;;  %v1872_v15 = vld [vmem:[%s2518_s3 + $0x34c] ss:$16 sps:$4 sm:$0xff]   ;;  %v1870_v17 = vld [vmem:[%s2518_s3 + $0x348] ss:$16 sps:$4 sm:$0xff]  }
  0xdb   :  { %v116_v21 = vadd.f32 %v115_v20, %v42_v16  ;;  %v117_v22 = vpop.f32.mrb[2].mxu0  ;;  %v157_v28 = vadd.f32 %v156_v26, %v50_v18  ;;  %v158_v29 = vpop.f32.mrb[2].mxu1  ;;  %v1867_v16 = vld [vmem:[%s2518_s3 + $0x340] ss:$16 sps:$4 sm:$0xff]   ;;  %v1875_v18 = vld [vmem:[%s2518_s3 + $0x364] ss:$16 sps:$4 sm:$0xff]  }
  0xdc   :  { %v161_v24 = vmax.f32 %v114_v19, 0.0  ;;  %v118_v25 = vpop.f32.mrb[3].mxu0  ;;  %v159_v30 = vpop.f32.mrb[3].mxu1  ;;  %v1878_v19 = vld [vmem:[%s2518_s3 + $0x36c] ss:$16 sps:$4 sm:$0xff]  }
  0xdd   :  { %v162_v27 = vmax.f32 %v116_v21, 0.0  ;;  %v164_v34 = vmax.f32 %v157_v28, 0.0  ;;  %v1873_v20 = vld [vmem:[%s2518_s3 + $0x360] ss:$16 sps:$4 sm:$0xff]   ;;  %v1876_v21 = vld [vmem:[%s2518_s3 + $0x368] ss:$16 sps:$4 sm:$0xff]  }
  0xde   :  { %v165_v35 = vpack.c.bf16 %v161_v24, %v161_v24  ;;  %v1881_v22 = vld [vmem:[%s2518_s3 + $0x384] ss:$16 sps:$4 sm:$0xff]   ;;  %v1884_v24 = vld [vmem:[%s2518_s3 + $0x38c] ss:$16 sps:$4 sm:$0xff]   ;;  %v1879_v25 = vld [vmem:[%s2518_s3 + $0x380] ss:$16 sps:$4 sm:$0xff]  }
  0xdf   :  { %v166_v31 = vpack.c.bf16 %v162_v27, %v162_v27  ;;  %v168_v38 = vpack.c.bf16 %v164_v34, %v164_v34  ;;  %v1882_v26 = vld [vmem:[%s2518_s3 + $0x388] ss:$16 sps:$4 sm:$0xff]   ;;  %v45_v27 = vsub.s32 2, %v2191_v10  ;;  %v1887_v28 = vld [vmem:[%s2518_s3 + $0x3a4] ss:$16 sps:$4 sm:$0xff]  }
  0xe0   :  { %v1890_v29 = vld [vmem:[%s2518_s3 + $0x3ac] ss:$16 sps:$4 sm:$0xff]   ;;  %v1885_v30 = vld [vmem:[%s2518_s3 + $0x3a0] ss:$16 sps:$4 sm:$0xff]  }
  0xe1   :  { %991 = vmatprep.mubr.bf16.mxu0 %v166_v31  ;;  %1073 = vmatprep.mubr.bf16.mxu1 %v166_v31  ;;  %v1888_v31 = vld [vmem:[%s2518_s3 + $0x3a8] ss:$16 sps:$4 sm:$0xff]   ;;  %v1896_v34 = vld [vmem:[%s2518_s3 + $0x3cc] ss:$16 sps:$4 sm:$0xff]  }
  0xe2   :  { %992 = vmatmul.mubr.bf16.vlgmr.msra.gmra.mrb[4].mxu0 %v165_v35  ;;  %1074 = vmatmul.mubr.bf16.vlgmr.msra.gmra.mrb[4].mxu1 %v165_v35  ;;  %v1891_v35 = vld [vmem:[%s2518_s3 + $0x3c0] ss:$16 sps:$4 sm:$0xff]  }
  0xe3   :  { %1001 = vmatpush1.bf16.msra.mxu0 %v1807_v32  ;;  %1083 = vmatpush1.bf16.msra.mxu1 %v1810_v33  ;;  %v46_v32 = vrot.slane %v2197_v12, %v45_v27  ;;  %v1893_v33 = vld [vmem:[%s2518_s3 + $0x3c4] ss:$16 sps:$4 sm:$0xff]   ;;  %v1894_v12 = vld [vmem:[%s2518_s3 + $0x3c8] ss:$16 sps:$4 sm:$0xff]  }
  0xe4   :  { %1002 = vmatprep.subr.bf16.mxu0 %v1815_v36  ;;  %1084 = vmatprep.subr.bf16.mxu1 %v1818_v37  ;;  %v1899_v37 = vld [vmem:[%s2518_s3 + $0x3e4] ss:$16 sps:$4 sm:$0xff]  }
  0xe5   :  { %1032 = vmatprep.mubr.bf16.mxu0 %v168_v38  ;;  %1114 = vmatprep.mubr.bf16.mxu1 %v168_v38  ;;  %v155_v36 = vadd.f32 %v2210_v23, %v46_v32  ;;  %v1902_v38 = vld [vmem:[%s2518_s3 + $0x3ec] ss:$16 sps:$4 sm:$0xff]   ;;  %v1900_v23 = vld [vmem:[%s2518_s3 + $0x3e8] ss:$16 sps:$4 sm:$0xff]  }
  0xe7   :  { %1003 = vmatpush1.bf16.msra.mxu0 %v1813_v39  ;;  %1085 = vmatpush1.bf16.msra.mxu1 %v1816_v40  ;;  %v1897_v39 = vld [vmem:[%s2518_s3 + $0x3e0] ss:$16 sps:$4 sm:$0xff]   ;;  %v163_v40 = vmax.f32 %v155_v36, 0.0 }
  0xe8   :  { %1004 = vmatprep.subr.bf16.mxu0 %v1821_v41  ;;  %1086 = vmatprep.subr.bf16.mxu1 %v1824_v42  ;;  %v1903_v41 = vld [vmem:[%s2519_s5 + $0x40] sm:$0xff]  }
  0xe9   :  { %v1904_v42 = vld [vmem:[%s2519_s5 + $0xc0] sm:$0xff]  }
  0xeb   :  { %1005 = vmatpush1.bf16.msra.mxu0 %v1819_v43  ;;  %1087 = vmatpush1.bf16.msra.mxu1 %v1822_v44  ;;  %v1905_v43 = vld [vmem:[%s2519_s5] sm:$0xff]  }
  0xec   :  { %1006 = vmatprep.subr.bf16.mxu0 %v1827_v45  ;;  %1088 = vmatprep.subr.bf16.mxu1 %v1830_v46  ;;  %v1906_v44 = vld [vmem:[%s2519_s5 + $0x80] sm:$0xff]   ;;  %v167_v45 = vpack.c.bf16 %v163_v40, %v163_v40  ;;  %v1907_v46 = vld [vmem:[%s2519_s5 + $0x48] sm:$0xff]  }
  0xef   :  { %1007 = vmatpush1.bf16.msra.mxu0 %v1825_v47  ;;  %1089 = vmatpush1.bf16.msra.mxu1 %v1828_v48  ;;  %v1908_v47 = vld [vmem:[%s2519_s5 + $0xc8] sm:$0xff]  }
  0xf0   :  { %1008 = vmatprep.subr.bf16.mxu0 %v1833_v49  ;;  %1090 = vmatprep.subr.bf16.mxu1 %v1836_v50  ;;  %v1909_v48 = vld [vmem:[%s2519_s5 + $0x8] sm:$0xff]   ;;  %v1911_v50 = vld [vmem:[%s2519_s5 + $0x50] sm:$0xff]  }
  0xf1   :  { %v1910_v49 = vld [vmem:[%s2519_s5 + $0x88] sm:$0xff]  }
  0xf3   :  { %1009 = vmatpush1.bf16.msra.mxu0 %v1831_v51  ;;  %1091 = vmatpush1.bf16.msra.mxu1 %v1834_v52  ;;  %v1912_v51 = vld [vmem:[%s2519_s5 + $0xd0] sm:$0xff]  }
  0xf4   :  { %1010 = vmatprep.subr.bf16.mxu0 %v1839_v53  ;;  %1092 = vmatprep.subr.bf16.mxu1 %v1842_v54  ;;  %v1913_v52 = vld [vmem:[%s2519_s5 + $0x10] sm:$0xff]   ;;  %v1915_v54 = vld [vmem:[%s2519_s5 + $0x58] sm:$0xff]  }
  0xf5   :  { %v1914_v53 = vld [vmem:[%s2519_s5 + $0x90] sm:$0xff]  }
  0xf7   :  { %1011 = vmatpush1.bf16.msra.mxu0 %v1837_v55  ;;  %1093 = vmatpush1.bf16.msra.mxu1 %v1840_v56  ;;  %v1916_v55 = vld [vmem:[%s2519_s5 + $0xd8] sm:$0xff]  }
  0xf8   :  { %1012 = vmatprep.subr.bf16.mxu0 %v1845_v57  ;;  %1094 = vmatprep.subr.bf16.mxu1 %v1848_v58  ;;  %v1917_v56 = vld [vmem:[%s2519_s5 + $0x18] sm:$0xff]   ;;  %v1919_v58 = vld [vmem:[%s2519_s5 + $0x60] sm:$0xff]  }
  0xf9   :  { %v1918_v57 = vld [vmem:[%s2519_s5 + $0x98] sm:$0xff]  }
  0xfb   :  { %1013 = vmatpush1.bf16.msra.mxu0 %v1843_v59  ;;  %1095 = vmatpush1.bf16.msra.mxu1 %v1846_v60  ;;  %v1920_v59 = vld [vmem:[%s2519_s5 + $0xe0] sm:$0xff]  }
  0xfc   :  { %1014 = vmatprep.subr.bf16.mxu0 %v1851_v61  ;;  %1096 = vmatprep.subr.bf16.mxu1 %v1854_v62  ;;  %v1921_v60 = vld [vmem:[%s2519_s5 + $0x20] sm:$0xff]   ;;  %v1923_v62 = vld [vmem:[%s2519_s5 + $0x68] sm:$0xff]  }
  0xfd   :  { %v1922_v61 = vld [vmem:[%s2519_s5 + $0xa0] sm:$0xff]  }
  0xff   :  { %1015 = vmatpush1.bf16.msra.mxu0 %v1849_v63  ;;  %1097 = vmatpush1.bf16.msra.mxu1 %v1852_v0  ;;  %v1924_v63 = vld [vmem:[%s2519_s5 + $0xe8] sm:$0xff]  }
 0x100   :  { %1016 = vmatprep.subr.bf16.mxu0 %v1857_v1  ;;  %1098 = vmatprep.subr.bf16.mxu1 %v1860_v2  ;;  %v1925_v0 = vld [vmem:[%s2519_s5 + $0x28] sm:$0xff]   ;;  %v1927_v2 = vld [vmem:[%s2519_s5 + $0x70] sm:$0xff]  }
 0x101   :  { %v1926_v1 = vld [vmem:[%s2519_s5 + $0xa8] sm:$0xff]  }
 0x103   :  { %1017 = vmatpush1.bf16.msra.mxu0 %v1855_v3  ;;  %1099 = vmatpush1.bf16.msra.mxu1 %v1858_v4  ;;  %v1928_v3 = vld [vmem:[%s2519_s5 + $0xf0] sm:$0xff]  }
 0x104   :  { %1018 = vmatprep.subr.bf16.mxu0 %v1863_v5  ;;  %1100 = vmatprep.subr.bf16.mxu1 %v1866_v6  ;;  %v1929_v4 = vld [vmem:[%s2519_s5 + $0x30] sm:$0xff]   ;;  %v1931_v6 = vld [vmem:[%s2519_s5 + $0x78] sm:$0xff]  }
 0x105   :  { %v1930_v5 = vld [vmem:[%s2519_s5 + $0xb0] sm:$0xff]  }
 0x107   :  { %1019 = vmatpush1.bf16.msra.mxu0 %v1861_v7  ;;  %1101 = vmatpush1.bf16.msra.mxu1 %v1864_v8  ;;  %v1932_v7 = vld [vmem:[%s2519_s5 + $0xf8] sm:$0xff]  }
 0x108   :  { %1020 = vmatprep.subr.bf16.mxu0 %v1869_v9  ;;  %1102 = vmatprep.subr.bf16.mxu1 %v1872_v15  ;;  %v1933_v8 = vld [vmem:[%s2519_s5 + $0x38] sm:$0xff]   ;;  %v297_v15 = vld [vmem:[%s2521_s4] sm:$0xf] }
 0x109   :  { %v1934_v9 = vld [vmem:[%s2519_s5 + $0xb8] sm:$0xff]  }
 0x10b   :  { %1021 = vmatpush1.bf16.msra.mxu0 %v1867_v16  ;;  %1103 = vmatpush1.bf16.msra.mxu1 %v1870_v17  ;;  %v302_v16 = vrot.slane %v297_v15, %v37_v11  ;;  %v310_v17 = vrot.slane %v297_v15, %v45_v27 }
 0x10c   :  { %1022 = vmatprep.subr.bf16.mxu0 %v1875_v18  ;;  %1104 = vmatprep.subr.bf16.mxu1 %v1878_v19  ;;  %v306_v18 = vrot.slane %v297_v15, %v41_v13  ;;  %v314_v19 = vrot.slane %v297_v15, %v49_v14 }
 0x10f   :  { %1023 = vmatpush1.bf16.msra.mxu0 %v1873_v20  ;;  %1105 = vmatpush1.bf16.msra.mxu1 %v1876_v21 }
 0x110   :  { %1024 = vmatprep.subr.bf16.mxu0 %v1881_v22  ;;  %1106 = vmatprep.subr.bf16.mxu1 %v1884_v24 }
 0x113   :  { %1025 = vmatpush1.bf16.msra.mxu0 %v1879_v25  ;;  %1107 = vmatpush1.bf16.msra.mxu1 %v1882_v26 }
 0x114   :  { %1026 = vmatprep.subr.bf16.mxu0 %v1887_v28  ;;  %1108 = vmatprep.subr.bf16.mxu1 %v1890_v29 }
 0x117   :  { %1027 = vmatpush1.bf16.msra.mxu0 %v1885_v30  ;;  %1109 = vmatpush1.bf16.msra.mxu1 %v1888_v31 }
 0x118   :  { %1028 = vmatprep.subr.bf16.mxu0 %v1893_v33  ;;  %1110 = vmatprep.subr.bf16.mxu1 %v1896_v34 }
 0x11b   :  { %1029 = vmatpush1.bf16.msra.mxu0 %v1891_v35  ;;  %1111 = vmatpush1.bf16.msra.mxu1 %v1894_v12 }
 0x11c   :  { %1030 = vmatprep.subr.bf16.mxu0 %v1899_v37  ;;  %1112 = vmatprep.subr.bf16.mxu1 %v1902_v38  ;;  %v1615_v38 = vld [vmem:[%s2522_s6] ss:$0 sm:$0xff] }
 0x11f   :  { %1031 = vmatpush1.bf16.msra.mxu0 %v1897_v39  ;;  %1113 = vmatpush1.bf16.msra.mxu1 %v1900_v23 }
 0x120   :  { %1648 = vmatprep.subr.bf16.mxu0 %v1903_v41  ;;  %1670 = vmatprep.subr.bf16.mxu1 %v1904_v42 }
 0x122   :  { %1033 = vmatmul.mubr.bf16.vlgmr.msra.gmra.mrb[4].mxu0 %v167_v45  ;;  %1115 = vmatmul.mubr.bf16.vlgmr.msra.gmra.mrb[4].mxu1 %v167_v45 }
 0x123   :  { %1649 = vmatpush3.bf16.msra.mxu0 %v1905_v43  ;;  %1671 = vmatpush3.bf16.msra.mxu1 %v1906_v44 }
 0x124   :  { %1650 = vmatprep.subr.bf16.mxu0 %v1907_v46  ;;  %1672 = vmatprep.subr.bf16.mxu1 %v1908_v47 }
 0x127   :  { %1651 = vmatpush3.bf16.msra.mxu0 %v1909_v48  ;;  %1673 = vmatpush3.bf16.msra.mxu1 %v1910_v49 }
 0x128   :  { %1652 = vmatprep.subr.bf16.mxu0 %v1911_v50  ;;  %1674 = vmatprep.subr.bf16.mxu1 %v1912_v51 }
 0x12b   :  { %1653 = vmatpush3.bf16.msra.mxu0 %v1913_v52  ;;  %1675 = vmatpush3.bf16.msra.mxu1 %v1914_v53 }
 0x12c   :  { %1654 = vmatprep.subr.bf16.mxu0 %v1915_v54  ;;  %1676 = vmatprep.subr.bf16.mxu1 %v1916_v55 }
 0x12f   :  { %1655 = vmatpush3.bf16.msra.mxu0 %v1917_v56  ;;  %1677 = vmatpush3.bf16.msra.mxu1 %v1918_v57 }
 0x130   :  { %1656 = vmatprep.subr.bf16.mxu0 %v1919_v58  ;;  %1678 = vmatprep.subr.bf16.mxu1 %v1920_v59 }
 0x133   :  { %1657 = vmatpush3.bf16.msra.mxu0 %v1921_v60  ;;  %1679 = vmatpush3.bf16.msra.mxu1 %v1922_v61 }
 0x134   :  { %1658 = vmatprep.subr.bf16.mxu0 %v1923_v62  ;;  %1680 = vmatprep.subr.bf16.mxu1 %v1924_v63 }
 0x137   :  { %1659 = vmatpush3.bf16.msra.mxu0 %v1925_v0  ;;  %1681 = vmatpush3.bf16.msra.mxu1 %v1926_v1 }
 0x138   :  { %1660 = vmatprep.subr.bf16.mxu0 %v1927_v2  ;;  %1682 = vmatprep.subr.bf16.mxu1 %v1928_v3 }
 0x13b   :  { %1661 = vmatpush3.bf16.msra.mxu0 %v1929_v4  ;;  %1683 = vmatpush3.bf16.msra.mxu1 %v1930_v5 }
 0x13c   :  { %1662 = vmatprep.subr.bf16.mxu0 %v1931_v6  ;;  %1684 = vmatprep.subr.bf16.mxu1 %v1932_v7 }
 0x13f   :  { %1663 = vmatpush3.bf16.msra.mxu0 %v1933_v8  ;;  %1685 = vmatpush3.bf16.msra.mxu1 %v1934_v9 }
 0x1f5   :  { %v1034_v20 = vpop.f32.mrb[4].mxu0  ;;  %v1116_v21 = vpop.f32.mrb[4].mxu1 }
 0x1f6   :  { %v1692_v22 = vadd.f32 %v1034_v20, %v302_v16  ;;  %v1694_v24 = vadd.f32 %v1116_v21, %v310_v17  ;;  %v1036_v25 = vpop.f32.mrb[5].mxu0  ;;  %v1118_v26 = vpop.f32.mrb[5].mxu1 }
 0x1f7   :  { %v1693_v28 = vadd.f32 %v1036_v25, %v306_v18  ;;  %v1695_v29 = vadd.f32 %v1118_v26, %v314_v19  ;;  %v1038_v30 = vpop.f32.mrb[6].mxu0  ;;  %v1120_v31 = vpop.f32.mrb[6].mxu1 }
 0x1f8   :  { %v1123_v11 = vmax.f32 %v1692_v22, 0.0  ;;  %v1125_v32 = vmax.f32 %v1694_v24, 0.0  ;;  %v1039_v33 = vpop.f32.mrb[7].mxu0  ;;  %v1121_v27 = vpop.f32.mrb[7].mxu1 }
 0x1f9   :  { %v1124_v34 = vmax.f32 %v1693_v28, 0.0  ;;  %v1126_v35 = vmax.f32 %v1695_v29, 0.0 }
 0x1fa   :  { %v1127_v10 = vpack.c.bf16 %v1123_v11, %v1123_v11  ;;  %v1129_v14 = vpack.c.bf16 %v1125_v32, %v1125_v32 }
 0x1fb   :  { %v1128_v13 = vpack.c.bf16 %v1124_v34, %v1124_v34  ;;  %v1130_v12 = vpack.c.bf16 %v1126_v35, %v1126_v35 }
 0x1fd   :  { %1426 = vmatprep.mubr.bf16.mxu0 %v1128_v13  ;;  %1466 = vmatprep.mubr.bf16.mxu1 %v1130_v12 }
 0x1fe   :  { %1427 = vmatmul.mubr.bf16.vlgmr.msra.gmra.mrb[8].mxu0 %v1127_v10  ;;  %1467 = vmatmul.mubr.bf16.vlgmr.msra.gmra.mrb[8].mxu1 %v1129_v14 }
 0x2d1   :  { %v1664_v36 = vpop.f32.mrb[8].mxu0  ;;  %v1686_v37 = vpop.f32.mrb[8].mxu1 }
 0x2d2   :  { %v1665_v39 = vpop.f32.mrb[9].mxu0  ;;  %v1687_v23 = vpop.f32.mrb[9].mxu1 }
 0x2d3   :  { %v1666_v40 = vadd.f32 %v1665_v39, %v1664_v36  ;;  %v1688_v41 = vadd.f32 %v1687_v23, %v1686_v37  ;;  %v1667_v42 = vpop.f32.mrb[10].mxu0  ;;  %v1689_v43 = vpop.f32.mrb[10].mxu1 }
 0x2d4   :  { %v1668_v44 = vpop.f32.mrb[11].mxu0  ;;  %v1690_v45 = vpop.f32.mrb[11].mxu1 }
 0x2d5   :  { %v1429_v46 = vadd.f32 %v1666_v40, %v1615_v38 }
 0x2d7   :  { %v1469_v47 = vadd.f32 %v1688_v41, %v1429_v46 }
 0x2d9   :  { %1935 = vtanh.f32 %v1469_v47 }
 0x2e3   :  { %v1936_v48 = vpop.eup %1935 }
 0x2e4   :  { %v1475_v49 = vpack.c.bf16 %v1936_v48, %v1936_v48 }
 0x2e6   :  { %1476 = vst [vmem:[%s2523_s7] sm:$0xf] %v1475_v49 }

</bundles_post_ra>
